<compile_context>
chip_gen: v7x
topology: tpu7x:2x2x1
jax: 0.10.0
libtpu: 0.0.40
codegen_flags: <defaults>
</compile_context>

<pallas_src>
import functools

import jax
import jax.numpy as jnp
from jax import lax
from jax.experimental import pallas as pl
from jax.experimental.pallas import tpu as pltpu

C1 = 64      # conv1 out channels (PyTorch)
C1P = 128    # lane-dense padded channel count carried through pool1 / conv2 input
C2 = 128     # conv2 out channels
KH = KW = 3


# ------------------------------ fused kernel --------------------------------

def _backbone2l_kernel(p1e_ref, p1o_ref, w1_ref, b1_ref, w2_ref, b2_ref,
                       o_ref, se_ref, so_ref, *,
                       BB, Ho1u, E1p, O1p, O1, Hqu, Wo2, Hf, Wf, R2):
    """BB images per grid step: conv1+ReLU+pool1+conv2+ReLU+pool2, all in VMEM.

    p1e/p1o: conv1 im2col patches for even / odd output columns (trimmed to the
             conv1 rows pool2 consumes, sublane-padded), bf16.
    se/so:   zero-padded conv2 input split into even / odd padded columns so every
             conv2 tap is a unit-stride slice, bf16.
    """
    # ---- conv1 (+bias+ReLU): one MXU matmul each for even / odd column patches,
    #      all BB images flattened into M ----
    w1 = w1_ref[...]                                             # (9, 128) bf16
    b1 = b1_ref[...]                                             # (1, 128) f32
    h1e = jnp.dot(p1e_ref[...].reshape(BB * Ho1u * E1p, KH * KW), w1,
                  preferred_element_type=jnp.float32)
    h1o = jnp.dot(p1o_ref[...].reshape(BB * Ho1u * O1p, KH * KW), w1,
                  preferred_element_type=jnp.float32)
    # Cast to bf16 right after bias+ReLU: max commutes with monotone rounding and
    # these values only feed bf16 MXU matmuls -> half the vreg/VMEM footprint.
    h1e = jnp.maximum(h1e + b1, 0.0).astype(jnp.bfloat16).reshape(BB, Ho1u, E1p, C1P)
    h1o = jnp.maximum(h1o + b1, 0.0).astype(jnp.bfloat16).reshape(BB, Ho1u, O1p, C1P)

    # ---- conv2 zero padding: only the top (and possibly bottom) padded rows need
    #      explicit zeros; interior rows are fully overwritten below (left/right
    #      zero columns are concatenated into the row store).  Cheap (~10 KiB/img)
    #      and correct regardless of how the grid is sharded across cores. ----
    se_ref[:, 0:2, :, :] = jnp.zeros((BB, 2, Wo2 + 1, C1P), jnp.bfloat16)
    so_ref[:, 0:2, :, :] = jnp.zeros((BB, 2, Wo2, C1P), jnp.bfloat16)
    if 2 + Hqu < R2:   # very short images: bottom padded rows are also read
        se_ref[:, 2 + Hqu:R2, :, :] = jnp.zeros((BB, R2 - 2 - Hqu, Wo2 + 1, C1P),
                                                jnp.bfloat16)
        so_ref[:, 2 + Hqu:R2, :, :] = jnp.zeros((BB, R2 - 2 - Hqu, Wo2, C1P),
                                                jnp.bfloat16)

    # ---- maxpool1 (2,2)/(2,1), fused; only the Hqu rows conv2/pool2 consume.
    #      Full-width row stores -> no offset-1 masked scatter. ----
    zc = jnp.zeros((BB, 1, C1P), jnp.bfloat16)
    for hp in range(Hqu):
        me = jnp.maximum(h1e[:, 2 * hp], h1e[:, 2 * hp + 1])     # conv1 even cols
        mo = jnp.maximum(h1o[:, 2 * hp], h1o[:, 2 * hp + 1])     # conv1 odd cols
        pe = jnp.maximum(me[:, 0:O1], mo[:, 0:O1])               # pool1 cols 0,2,...
        po = jnp.maximum(mo[:, 0:O1], me[:, 1:O1 + 1])           # pool1 cols 1,3,...
        se_ref[:, 2 + hp, :, :] = jnp.concatenate([zc, pe, zc], axis=1)
        so_ref[:, 2 + hp, :, :] = jnp.concatenate([zc, po], axis=1)

    # ---- conv2 (+bias+ReLU) as ONE MXU matmul: 9 taps concatenated along K
    #      (128-lane boundaries), all output rows & images concatenated along M ----
    parts = []
    for ho in range(2 * Hf):                                     # pool2 reads rows 0..2*Hf-1
        taps = []
        for dh in range(KH):
            r = 3 * ho + dh                                      # padded conv2-input row
            taps.append(se_ref[:, r, 0:Wo2, :])                  # dw=0: padded cols 0,2,...
            taps.append(so_ref[:, r, 0:Wo2, :])                  # dw=1: padded cols 1,3,...
            taps.append(se_ref[:, r, 1:Wo2 + 1, :])              # dw=2: padded cols 2,4,...
        parts.append(jnp.concatenate(taps, axis=-1))             # (BB, Wo2, 9*128)
    lhs = jnp.concatenate(parts, axis=1)                         # (BB, 2*Hf*Wo2, 9*128)
    h2 = jnp.dot(lhs.reshape(BB * 2 * Hf * Wo2, KH * KW * C1P), w2_ref[...],
                 preferred_element_type=jnp.float32)             # single MXU matmul
    h2 = jnp.maximum(h2 + b2_ref[...], 0.0).reshape(BB, 2 * Hf, Wo2, C2)

    # ---- maxpool2 (2,2)/(2,1), fused into the lane-dense output store ----
    for hf in range(Hf):
        m = jnp.maximum(h2[:, 2 * hf], h2[:, 2 * hf + 1])        # (BB, Wo2, 128)
        o_ref[:, hf, :, :] = jnp.maximum(m[:, 0:Wf], m[:, 1:Wf + 1])


# --------------------------------- wrapper ----------------------------------

def _pick_block_batch(n):
    # Batch several images per grid step so the conv matmuls get real M, but keep
    # >= 2 grid steps when possible so v7x can still shard the grid across its TCs.
    for bb in (8, 4, 2):
        if n % bb == 0 and n // bb >= 2:
            return bb
    return 1


@jax.jit
def backbone2l_forward(params, x_nchw):
    N, Cin, H, W = x_nchw.shape
    assert Cin == 1

    # conv1 geometry: 3x3, stride (3,2), padding (2,2)
    Hp1, Wp1 = H + 4, W + 4
    Ho1 = (Hp1 - KH) // 3 + 1
    Wo1 = (Wp1 - KW) // 2 + 1
    assert Wo1 % 2 == 1, "kernel specialization assumes odd conv1 output width"
    E1, O1 = (Wo1 + 1) // 2, Wo1 // 2                  # even / odd conv1 column counts

    # pool1 / conv2 / pool2 geometry
    Hq1 = (Ho1 - 2) // 2 + 1                           # pool1 out H
    Wq1 = Wo1 - 1                                      # pool1 out W (even)
    Hp2, Wp2 = Hq1 + 4, Wq1 + 4                        # conv2 padded input
    Ho2 = (Hp2 - KH) // 3 + 1
    Wo2 = (Wp2 - KW) // 2 + 1
    Hf = (Ho2 - 2) // 2 + 1                            # pool2 out H
    Wf = Wo2 - 1                                       # pool2 out W
    assert O1 == Wo2 - 1 and E1 == O1 + 1

    # Trim to what pool2 actually consumes: conv2 rows 0..2*Hf-1 only read padded
    # conv2-input rows 0..3*(2*Hf-1)+2, i.e. pool1 rows 0..3*(2*Hf-1) and conv1
    # rows 0..2*(3*(2*Hf-1))+1.
    R2 = min(Hp2, 3 * (2 * Hf - 1) + 3)                # conv2 scratch rows
    Hqu = min(Hq1, 3 * (2 * Hf - 1) + 1)               # pool1 rows actually consumed
    Ho1u = 2 * Hqu                                     # conv1 rows actually consumed
    E1p = -(-E1 // 8) * 8                              # sublane-align pool1 slices
    O1p = -(-O1 // 8) * 8

    BB = _pick_block_batch(N)

    # ---- conv1 im2col in the wrapper (Cin=1 => tiny), trimmed + sublane-padded ----
    xp = jnp.pad(x_nchw[:, 0], ((0, 0), (2, 2), (2, 2)))
    taps = []
    for dh in range(KH):
        for dw in range(KW):
            taps.append(xp[:, dh:dh + 3 * (Ho1u - 1) + 1:3,
                            dw:dw + 2 * (Wo1 - 1) + 1:2])
    p1 = jnp.stack(taps, axis=-1).astype(jnp.bfloat16)                # (N,Ho1u,Wo1,9)
    p1e = jnp.pad(p1[:, :, 0::2, :], ((0, 0), (0, 0), (0, E1p - E1), (0, 0)))
    p1o = jnp.pad(p1[:, :, 1::2, :], ((0, 0), (0, 0), (0, O1p - O1), (0, 0)))
    p1e = p1e.reshape(N, Ho1u * E1p, KH * KW)
    p1o = p1o.reshape(N, Ho1u * O1p, KH * KW)

    # ---- weights: lane-dense (128-channel) layout, bf16 for the MXU ----
    w1 = jnp.transpose(params["w1"], (2, 3, 1, 0)).reshape(KH * KW, C1)
    w1 = jnp.pad(w1, ((0, 0), (0, C1P - C1))).astype(jnp.bfloat16)            # (9,128)
    b1 = jnp.pad(params["b1"], (0, C1P - C1)).reshape(1, C1P).astype(jnp.float32)
    w2 = jnp.transpose(params["w2"], (2, 3, 1, 0))                            # (3,3,64,128)
    w2 = jnp.pad(w2, ((0, 0), (0, 0), (0, C1P - C1), (0, 0)))
    w2k = w2.reshape(KH * KW * C1P, C2).astype(jnp.bfloat16)                  # (1152,128)
    b2 = params["b2"].reshape(1, C2).astype(jnp.float32)

    kernel = functools.partial(_backbone2l_kernel, BB=BB, Ho1u=Ho1u, E1p=E1p,
                               O1p=O1p, O1=O1, Hqu=Hqu, Wo2=Wo2, Hf=Hf, Wf=Wf, R2=R2)

    flops = (2 * N * Ho1u * (E1p + O1p) * KH * KW * C1P
             + 2 * N * 2 * Hf * Wo2 * KH * KW * C1P * C2)
    bytes_accessed = (p1e.size * 2 + p1o.size * 2 + w1.size * 2 + b1.size * 4
                      + w2k.size * 2 + b2.size * 4 + N * Hf * Wf * C2 * 4)

    out_nhwc = pl.pallas_call(
        kernel,
        out_shape=jax.ShapeDtypeStruct((N, Hf, Wf, C2), jnp.float32),
        grid=(N // BB,),
        in_specs=[
            pl.BlockSpec((BB, Ho1u * E1p, KH * KW), lambda i: (i, 0, 0)),
            pl.BlockSpec((BB, Ho1u * O1p, KH * KW), lambda i: (i, 0, 0)),
            pl.BlockSpec((KH * KW, C1P), lambda i: (0, 0)),
            pl.BlockSpec((1, C1P), lambda i: (0, 0)),
            pl.BlockSpec((KH * KW * C1P, C2), lambda i: (0, 0)),
            pl.BlockSpec((1, C2), lambda i: (0, 0)),
        ],
        out_specs=pl.BlockSpec((BB, Hf, Wf, C2), lambda i: (i, 0, 0, 0)),
        scratch_shapes=[
            pltpu.VMEM((BB, R2, Wo2 + 1, C1P), jnp.bfloat16),   # even padded columns
            pltpu.VMEM((BB, R2, Wo2, C1P), jnp.bfloat16),       # odd padded columns
        ],
        compiler_params=pltpu.CompilerParams(
            dimension_semantics=("parallel",)),
        cost_estimate=pl.CostEstimate(flops=int(flops), transcendentals=0,
                                      bytes_accessed=int(bytes_accessed)),
    )(p1e, p1o, w1, b1, w2k, b2)

    # Match the PyTorch module's NCHW output (downstream consumers that accept
    # NHWC can drop this transpose).
    return jnp.transpose(out_nhwc, (0, 3, 1, 2))


# --------------------------- params / reference -----------------------------

def init_params(key):
    # Deterministic synthetic init (shapes from Backbone2L.__init__).
    k1, k2, k3, k4 = jax.random.split(key, 4)
    return dict(
        w1=jax.random.normal(k1, (64, 1, 3, 3), jnp.float32) * 0.1,
        b1=jax.random.normal(k2, (64,), jnp.float32) * 0.1,
        w2=jax.random.normal(k3, (128, 64, 3, 3), jnp.float32) * 0.05,
        b2=jax.random.normal(k4, (128,), jnp.float32) * 0.1,
    )


def backbone2l_reference(params, x):
    def conv_relu(x, w, b):
        y = lax.conv_general_dilated(
            x, w, window_strides=(3, 2), padding=((2, 2), (2, 2)),
            dimension_numbers=("NCHW", "OIHW", "NCHW"))
        return jnp.maximum(y + b.reshape(1, -1, 1, 1), 0.0)

    def pool(x):
        return lax.reduce_window(x, -jnp.inf, lax.max,
                                 (1, 1, 2, 2), (1, 1, 2, 1), "VALID")

    x = pool(conv_relu(x, params["w1"], params["b1"]))
    x = pool(conv_relu(x, params["w2"], params["b2"]))
    return x


if __name__ == "__main__":
    key = jax.random.PRNGKey(0)
    pkey, xkey = jax.random.split(key)
    params = init_params(pkey)
    # grayscale input, PyTorch NCHW: (batch=2, channels=1, H=32, W=32)
    x = jax.random.normal(xkey, (2, 1, 32, 32), jnp.float32)

    out = jax.block_until_ready(backbone2l_forward(params, x))
    ref = jax.block_until_ready(backbone2l_reference(params, x))

    assert out.shape == (2, 128, 1, 8), out.shape
    # bf16 MXU inputs (f32 accumulation) => compare with a bf16-appropriate tolerance.
    err = float(jnp.max(jnp.abs(out - ref)))
    assert jnp.allclose(out, ref, atol=2e-2, rtol=2e-2), err
    print("KERNEL_OK")
</pallas_src>

<mosaic_0001>
module attributes {stable_mosaic.version = 11 : i64} {
  func.func @_backbone2l_kernel(%arg0: i32, %arg1: memref<1x128x9xbf16, #tpu.memory_space<vmem>>, %arg2: memref<1x64x9xbf16, #tpu.memory_space<vmem>>, %arg3: memref<9x128xbf16, #tpu.memory_space<vmem>>, %arg4: memref<1x128xf32, #tpu.memory_space<vmem>>, %arg5: memref<1152x128xbf16, #tpu.memory_space<vmem>>, %arg6: memref<1x128xf32, #tpu.memory_space<vmem>>, %arg7: memref<1x1x8x128xf32, #tpu.memory_space<vmem>>, %arg8: memref<1x6x10x128xbf16, #tpu.memory_space<vmem>>, %arg9: memref<1x6x9x128xbf16, #tpu.memory_space<vmem>>) attributes {dimension_semantics = [#tpu.dimension_semantics<parallel>], iteration_bounds = array<i64: 2>, scalar_prefetch = 0 : i64, scratch_operands = 2 : i64, tpu.core_type = #tpu.core_type<tc>, window_params = [{transform_indices = @transform_0, window_bounds = array<i64: 1, 128, 9>}, {transform_indices = @transform_1, window_bounds = array<i64: 1, 64, 9>}, {pipeline_mode = #tpu.pipeline_mode<synchronous>, transform_indices = @transform_2, window_bounds = array<i64: 9, 128>}, {pipeline_mode = #tpu.pipeline_mode<synchronous>, transform_indices = @transform_3, window_bounds = array<i64: 1, 128>}, {pipeline_mode = #tpu.pipeline_mode<synchronous>, transform_indices = @transform_4, window_bounds = array<i64: 1152, 128>}, {pipeline_mode = #tpu.pipeline_mode<synchronous>, transform_indices = @transform_5, window_bounds = array<i64: 1, 128>}, {transform_indices = @transform_6, window_bounds = array<i64: 1, 1, 8, 128>}]} {
    %c0 = arith.constant 0 : index
    %c0_0 = arith.constant 0 : index
    %0 = vector.load %arg3[%c0, %c0_0] : memref<9x128xbf16, #tpu.memory_space<vmem>>, vector<9x128xbf16>
    %c0_1 = arith.constant 0 : index
    %c0_2 = arith.constant 0 : index
    %1 = vector.load %arg4[%c0_1, %c0_2] : memref<1x128xf32, #tpu.memory_space<vmem>>, vector<1x128xf32>
    %c0_3 = arith.constant 0 : index
    %c0_4 = arith.constant 0 : index
    %c0_5 = arith.constant 0 : index
    %2 = vector.load %arg1[%c0_3, %c0_4, %c0_5] : memref<1x128x9xbf16, #tpu.memory_space<vmem>>, vector<1x128x9xbf16>
    %3 = vector.shape_cast %2 : vector<1x128x9xbf16> to vector<128x9xbf16>
    %cst = arith.constant dense<0.000000e+00> : vector<128x128xf32>
    %4 = tpu.matmul %3, %0, %cst {dimension_numbers = #tpu.dot_dimension_numbers<[1], [0], [0], [1], [0, 0, 1, 1], [], []>} : vector<128x9xbf16>, vector<9x128xbf16>, vector<128x128xf32> -> vector<128x128xf32>
    %c0_6 = arith.constant 0 : index
    %c0_7 = arith.constant 0 : index
    %c0_8 = arith.constant 0 : index
    %5 = vector.load %arg2[%c0_6, %c0_7, %c0_8] : memref<1x64x9xbf16, #tpu.memory_space<vmem>>, vector<1x64x9xbf16>
    %6 = vector.shape_cast %5 : vector<1x64x9xbf16> to vector<64x9xbf16>
    %cst_9 = arith.constant dense<0.000000e+00> : vector<64x128xf32>
    %7 = tpu.matmul %6, %0, %cst_9 {dimension_numbers = #tpu.dot_dimension_numbers<[1], [0], [0], [1], [0, 0, 1, 1], [], []>} : vector<64x9xbf16>, vector<9x128xbf16>, vector<64x128xf32> -> vector<64x128xf32>
    %8 = vector.broadcast %1 : vector<1x128xf32> to vector<128x128xf32>
    %9 = arith.addf %4, %8 : vector<128x128xf32>
    %cst_10 = arith.constant 0.000000e+00 : f32
    %10 = vector.broadcast %cst_10 : f32 to vector<128x128xf32>
    %11 = arith.maximumf %9, %10 : vector<128x128xf32>
    %12 = arith.truncf %11 : vector<128x128xf32> to vector<128x128xbf16>
    %13 = vector.shape_cast %12 : vector<128x128xbf16> to vector<1x8x16x128xbf16>
    %14 = vector.broadcast %1 : vector<1x128xf32> to vector<64x128xf32>
    %15 = arith.addf %7, %14 : vector<64x128xf32>
    %cst_11 = arith.constant 0.000000e+00 : f32
    %16 = vector.broadcast %cst_11 : f32 to vector<64x128xf32>
    %17 = arith.maximumf %15, %16 : vector<64x128xf32>
    %18 = arith.truncf %17 : vector<64x128xf32> to vector<64x128xbf16>
    %19 = vector.shape_cast %18 : vector<64x128xbf16> to vector<1x8x8x128xbf16>
    %cst_12 = arith.constant 0.000000e+00 : bf16
    %20 = vector.broadcast %cst_12 : bf16 to vector<1x2x10x128xbf16>
    %c0_13 = arith.constant 0 : index
    %c0_14 = arith.constant 0 : index
    %c0_15 = arith.constant 0 : index
    %c0_16 = arith.constant 0 : index
    %21 = vector.load %arg8[%c0_13, %c0_14, %c0_15, %c0_16] : memref<1x6x10x128xbf16, #tpu.memory_space<vmem>>, vector<1x2x10x128xbf16>
    tpu.vector_store %arg8[%c0_13, %c0_14, %c0_15, %c0_16], %20 {strides = array<i32>} : memref<1x6x10x128xbf16, #tpu.memory_space<vmem>>, vector<1x2x10x128xbf16>,
    %cst_17 = arith.constant 0.000000e+00 : bf16
    %22 = vector.broadcast %cst_17 : bf16 to vector<1x2x9x128xbf16>
    %c0_18 = arith.constant 0 : index
    %c0_19 = arith.constant 0 : index
    %c0_20 = arith.constant 0 : index
    %c0_21 = arith.constant 0 : index
    %23 = vector.load %arg9[%c0_18, %c0_19, %c0_20, %c0_21] : memref<1x6x9x128xbf16, #tpu.memory_space<vmem>>, vector<1x2x9x128xbf16>
    tpu.vector_store %arg9[%c0_18, %c0_19, %c0_20, %c0_21], %22 {strides = array<i32>} : memref<1x6x9x128xbf16, #tpu.memory_space<vmem>>, vector<1x2x9x128xbf16>,
    %cst_22 = arith.constant 0.000000e+00 : bf16
    %24 = vector.broadcast %cst_22 : bf16 to vector<1x1x128xbf16>
    %25 = vector.extract_strided_slice %13 {offsets = [0, 0, 0, 0], sizes = [1, 1, 16, 128], strides = [1, 1, 1, 1]} : vector<1x8x16x128xbf16> to vector<1x1x16x128xbf16>
    %26 = vector.shape_cast %25 : vector<1x1x16x128xbf16> to vector<1x16x128xbf16>
    %27 = vector.extract_strided_slice %13 {offsets = [0, 1, 0, 0], sizes = [1, 1, 16, 128], strides = [1, 1, 1, 1]} : vector<1x8x16x128xbf16> to vector<1x1x16x128xbf16>
    %28 = vector.shape_cast %27 : vector<1x1x16x128xbf16> to vector<1x16x128xbf16>
    %29 = arith.maximumf %26, %28 : vector<1x16x128xbf16>
    %30 = vector.extract_strided_slice %19 {offsets = [0, 0, 0, 0], sizes = [1, 1, 8, 128], strides = [1, 1, 1, 1]} : vector<1x8x8x128xbf16> to vector<1x1x8x128xbf16>
    %31 = vector.shape_cast %30 : vector<1x1x8x128xbf16> to vector<1x8x128xbf16>
    %32 = vector.extract_strided_slice %19 {offsets = [0, 1, 0, 0], sizes = [1, 1, 8, 128], strides = [1, 1, 1, 1]} : vector<1x8x8x128xbf16> to vector<1x1x8x128xbf16>
    %33 = vector.shape_cast %32 : vector<1x1x8x128xbf16> to vector<1x8x128xbf16>
    %34 = arith.maximumf %31, %33 : vector<1x8x128xbf16>
    %35 = vector.extract_strided_slice %29 {offsets = [0, 0, 0], sizes = [1, 8, 128], strides = [1, 1, 1]} : vector<1x16x128xbf16> to vector<1x8x128xbf16>
    %36 = arith.maximumf %35, %34 : vector<1x8x128xbf16>
    %37 = vector.extract_strided_slice %29 {offsets = [0, 1, 0], sizes = [1, 8, 128], strides = [1, 1, 1]} : vector<1x16x128xbf16> to vector<1x8x128xbf16>
    %38 = arith.maximumf %34, %37 : vector<1x8x128xbf16>
    %39 = tpu.concatenate %24, %36, %24 in 1 : vector<1x1x128xbf16>, vector<1x8x128xbf16>, vector<1x1x128xbf16> -> vector<1x10x128xbf16>
    %c0_23 = arith.constant 0 : index
    %c2 = arith.constant 2 : index
    %c0_24 = arith.constant 0 : index
    %c0_25 = arith.constant 0 : index
    %40 = vector.load %arg8[%c0_23, %c2, %c0_24, %c0_25] : memref<1x6x10x128xbf16, #tpu.memory_space<vmem>>, vector<1x1x10x128xbf16>
    %41 = vector.shape_cast %40 : vector<1x1x10x128xbf16> to vector<1x10x128xbf16>
    %42 = vector.shape_cast %39 : vector<1x10x128xbf16> to vector<1x1x10x128xbf16>
    tpu.vector_store %arg8[%c0_23, %c2, %c0_24, %c0_25], %42 {strides = array<i32>} : memref<1x6x10x128xbf16, #tpu.memory_space<vmem>>, vector<1x1x10x128xbf16>,
    %43 = tpu.concatenate %24, %38 in 1 : vector<1x1x128xbf16>, vector<1x8x128xbf16> -> vector<1x9x128xbf16>
    %c0_26 = arith.constant 0 : index
    %c2_27 = arith.constant 2 : index
    %c0_28 = arith.constant 0 : index
    %c0_29 = arith.constant 0 : index
    %44 = vector.load %arg9[%c0_26, %c2_27, %c0_28, %c0_29] : memref<1x6x9x128xbf16, #tpu.memory_space<vmem>>, vector<1x1x9x128xbf16>
    %45 = vector.shape_cast %44 : vector<1x1x9x128xbf16> to vector<1x9x128xbf16>
    %46 = vector.shape_cast %43 : vector<1x9x128xbf16> to vector<1x1x9x128xbf16>
    tpu.vector_store %arg9[%c0_26, %c2_27, %c0_28, %c0_29], %46 {strides = array<i32>} : memref<1x6x9x128xbf16, #tpu.memory_space<vmem>>, vector<1x1x9x128xbf16>,
    %47 = vector.extract_strided_slice %13 {offsets = [0, 2, 0, 0], sizes = [1, 1, 16, 128], strides = [1, 1, 1, 1]} : vector<1x8x16x128xbf16> to vector<1x1x16x128xbf16>
    %48 = vector.shape_cast %47 : vector<1x1x16x128xbf16> to vector<1x16x128xbf16>
    %49 = vector.extract_strided_slice %13 {offsets = [0, 3, 0, 0], sizes = [1, 1, 16, 128], strides = [1, 1, 1, 1]} : vector<1x8x16x128xbf16> to vector<1x1x16x128xbf16>
    %50 = vector.shape_cast %49 : vector<1x1x16x128xbf16> to vector<1x16x128xbf16>
    %51 = arith.maximumf %48, %50 : vector<1x16x128xbf16>
    %52 = vector.extract_strided_slice %19 {offsets = [0, 2, 0, 0], sizes = [1, 1, 8, 128], strides = [1, 1, 1, 1]} : vector<1x8x8x128xbf16> to vector<1x1x8x128xbf16>
    %53 = vector.shape_cast %52 : vector<1x1x8x128xbf16> to vector<1x8x128xbf16>
    %54 = vector.extract_strided_slice %19 {offsets = [0, 3, 0, 0], sizes = [1, 1, 8, 128], strides = [1, 1, 1, 1]} : vector<1x8x8x128xbf16> to vector<1x1x8x128xbf16>
    %55 = vector.shape_cast %54 : vector<1x1x8x128xbf16> to vector<1x8x128xbf16>
    %56 = arith.maximumf %53, %55 : vector<1x8x128xbf16>
    %57 = vector.extract_strided_slice %51 {offsets = [0, 0, 0], sizes = [1, 8, 128], strides = [1, 1, 1]} : vector<1x16x128xbf16> to vector<1x8x128xbf16>
    %58 = arith.maximumf %57, %56 : vector<1x8x128xbf16>
    %59 = vector.extract_strided_slice %51 {offsets = [0, 1, 0], sizes = [1, 8, 128], strides = [1, 1, 1]} : vector<1x16x128xbf16> to vector<1x8x128xbf16>
    %60 = arith.maximumf %56, %59 : vector<1x8x128xbf16>
    %61 = tpu.concatenate %24, %58, %24 in 1 : vector<1x1x128xbf16>, vector<1x8x128xbf16>, vector<1x1x128xbf16> -> vector<1x10x128xbf16>
    %c0_30 = arith.constant 0 : index
    %c3 = arith.constant 3 : index
    %c0_31 = arith.constant 0 : index
    %c0_32 = arith.constant 0 : index
    %62 = vector.load %arg8[%c0_30, %c3, %c0_31, %c0_32] : memref<1x6x10x128xbf16, #tpu.memory_space<vmem>>, vector<1x1x10x128xbf16>
    %63 = vector.shape_cast %62 : vector<1x1x10x128xbf16> to vector<1x10x128xbf16>
    %64 = vector.shape_cast %61 : vector<1x10x128xbf16> to vector<1x1x10x128xbf16>
    tpu.vector_store %arg8[%c0_30, %c3, %c0_31, %c0_32], %64 {strides = array<i32>} : memref<1x6x10x128xbf16, #tpu.memory_space<vmem>>, vector<1x1x10x128xbf16>,
    %65 = tpu.concatenate %24, %60 in 1 : vector<1x1x128xbf16>, vector<1x8x128xbf16> -> vector<1x9x128xbf16>
    %c0_33 = arith.constant 0 : index
    %c3_34 = arith.constant 3 : index
    %c0_35 = arith.constant 0 : index
    %c0_36 = arith.constant 0 : index
    %66 = vector.load %arg9[%c0_33, %c3_34, %c0_35, %c0_36] : memref<1x6x9x128xbf16, #tpu.memory_space<vmem>>, vector<1x1x9x128xbf16>
    %67 = vector.shape_cast %66 : vector<1x1x9x128xbf16> to vector<1x9x128xbf16>
    %68 = vector.shape_cast %65 : vector<1x9x128xbf16> to vector<1x1x9x128xbf16>
    tpu.vector_store %arg9[%c0_33, %c3_34, %c0_35, %c0_36], %68 {strides = array<i32>} : memref<1x6x9x128xbf16, #tpu.memory_space<vmem>>, vector<1x1x9x128xbf16>,
    %69 = vector.extract_strided_slice %13 {offsets = [0, 4, 0, 0], sizes = [1, 1, 16, 128], strides = [1, 1, 1, 1]} : vector<1x8x16x128xbf16> to vector<1x1x16x128xbf16>
    %70 = vector.shape_cast %69 : vector<1x1x16x128xbf16> to vector<1x16x128xbf16>
    %71 = vector.extract_strided_slice %13 {offsets = [0, 5, 0, 0], sizes = [1, 1, 16, 128], strides = [1, 1, 1, 1]} : vector<1x8x16x128xbf16> to vector<1x1x16x128xbf16>
    %72 = vector.shape_cast %71 : vector<1x1x16x128xbf16> to vector<1x16x128xbf16>
    %73 = arith.maximumf %70, %72 : vector<1x16x128xbf16>
    %74 = vector.extract_strided_slice %19 {offsets = [0, 4, 0, 0], sizes = [1, 1, 8, 128], strides = [1, 1, 1, 1]} : vector<1x8x8x128xbf16> to vector<1x1x8x128xbf16>
    %75 = vector.shape_cast %74 : vector<1x1x8x128xbf16> to vector<1x8x128xbf16>
    %76 = vector.extract_strided_slice %19 {offsets = [0, 5, 0, 0], sizes = [1, 1, 8, 128], strides = [1, 1, 1, 1]} : vector<1x8x8x128xbf16> to vector<1x1x8x128xbf16>
    %77 = vector.shape_cast %76 : vector<1x1x8x128xbf16> to vector<1x8x128xbf16>
    %78 = arith.maximumf %75, %77 : vector<1x8x128xbf16>
    %79 = vector.extract_strided_slice %73 {offsets = [0, 0, 0], sizes = [1, 8, 128], strides = [1, 1, 1]} : vector<1x16x128xbf16> to vector<1x8x128xbf16>
    %80 = arith.maximumf %79, %78 : vector<1x8x128xbf16>
    %81 = vector.extract_strided_slice %73 {offsets = [0, 1, 0], sizes = [1, 8, 128], strides = [1, 1, 1]} : vector<1x16x128xbf16> to vector<1x8x128xbf16>
    %82 = arith.maximumf %78, %81 : vector<1x8x128xbf16>
    %83 = tpu.concatenate %24, %80, %24 in 1 : vector<1x1x128xbf16>, vector<1x8x128xbf16>, vector<1x1x128xbf16> -> vector<1x10x128xbf16>
    %c0_37 = arith.constant 0 : index
    %c4 = arith.constant 4 : index
    %c0_38 = arith.constant 0 : index
    %c0_39 = arith.constant 0 : index
    %84 = vector.load %arg8[%c0_37, %c4, %c0_38, %c0_39] : memref<1x6x10x128xbf16, #tpu.memory_space<vmem>>, vector<1x1x10x128xbf16>
    %85 = vector.shape_cast %84 : vector<1x1x10x128xbf16> to vector<1x10x128xbf16>
    %86 = vector.shape_cast %83 : vector<1x10x128xbf16> to vector<1x1x10x128xbf16>
    tpu.vector_store %arg8[%c0_37, %c4, %c0_38, %c0_39], %86 {strides = array<i32>} : memref<1x6x10x128xbf16, #tpu.memory_space<vmem>>, vector<1x1x10x128xbf16>,
    %87 = tpu.concatenate %24, %82 in 1 : vector<1x1x128xbf16>, vector<1x8x128xbf16> -> vector<1x9x128xbf16>
    %c0_40 = arith.constant 0 : index
    %c4_41 = arith.constant 4 : index
    %c0_42 = arith.constant 0 : index
    %c0_43 = arith.constant 0 : index
    %88 = vector.load %arg9[%c0_40, %c4_41, %c0_42, %c0_43] : memref<1x6x9x128xbf16, #tpu.memory_space<vmem>>, vector<1x1x9x128xbf16>
    %89 = vector.shape_cast %88 : vector<1x1x9x128xbf16> to vector<1x9x128xbf16>
    %90 = vector.shape_cast %87 : vector<1x9x128xbf16> to vector<1x1x9x128xbf16>
    tpu.vector_store %arg9[%c0_40, %c4_41, %c0_42, %c0_43], %90 {strides = array<i32>} : memref<1x6x9x128xbf16, #tpu.memory_space<vmem>>, vector<1x1x9x128xbf16>,
    %91 = vector.extract_strided_slice %13 {offsets = [0, 6, 0, 0], sizes = [1, 1, 16, 128], strides = [1, 1, 1, 1]} : vector<1x8x16x128xbf16> to vector<1x1x16x128xbf16>
    %92 = vector.shape_cast %91 : vector<1x1x16x128xbf16> to vector<1x16x128xbf16>
    %93 = vector.extract_strided_slice %13 {offsets = [0, 7, 0, 0], sizes = [1, 1, 16, 128], strides = [1, 1, 1, 1]} : vector<1x8x16x128xbf16> to vector<1x1x16x128xbf16>
    %94 = vector.shape_cast %93 : vector<1x1x16x128xbf16> to vector<1x16x128xbf16>
    %95 = arith.maximumf %92, %94 : vector<1x16x128xbf16>
    %96 = vector.extract_strided_slice %19 {offsets = [0, 6, 0, 0], sizes = [1, 1, 8, 128], strides = [1, 1, 1, 1]} : vector<1x8x8x128xbf16> to vector<1x1x8x128xbf16>
    %97 = vector.shape_cast %96 : vector<1x1x8x128xbf16> to vector<1x8x128xbf16>
    %98 = vector.extract_strided_slice %19 {offsets = [0, 7, 0, 0], sizes = [1, 1, 8, 128], strides = [1, 1, 1, 1]} : vector<1x8x8x128xbf16> to vector<1x1x8x128xbf16>
    %99 = vector.shape_cast %98 : vector<1x1x8x128xbf16> to vector<1x8x128xbf16>
    %100 = arith.maximumf %97, %99 : vector<1x8x128xbf16>
    %101 = vector.extract_strided_slice %95 {offsets = [0, 0, 0], sizes = [1, 8, 128], strides = [1, 1, 1]} : vector<1x16x128xbf16> to vector<1x8x128xbf16>
    %102 = arith.maximumf %101, %100 : vector<1x8x128xbf16>
    %103 = vector.extract_strided_slice %95 {offsets = [0, 1, 0], sizes = [1, 8, 128], strides = [1, 1, 1]} : vector<1x16x128xbf16> to vector<1x8x128xbf16>
    %104 = arith.maximumf %100, %103 : vector<1x8x128xbf16>
    %105 = tpu.concatenate %24, %102, %24 in 1 : vector<1x1x128xbf16>, vector<1x8x128xbf16>, vector<1x1x128xbf16> -> vector<1x10x128xbf16>
    %c0_44 = arith.constant 0 : index
    %c5 = arith.constant 5 : index
    %c0_45 = arith.constant 0 : index
    %c0_46 = arith.constant 0 : index
    %106 = vector.load %arg8[%c0_44, %c5, %c0_45, %c0_46] : memref<1x6x10x128xbf16, #tpu.memory_space<vmem>>, vector<1x1x10x128xbf16>
    %107 = vector.shape_cast %106 : vector<1x1x10x128xbf16> to vector<1x10x128xbf16>
    %108 = vector.shape_cast %105 : vector<1x10x128xbf16> to vector<1x1x10x128xbf16>
    tpu.vector_store %arg8[%c0_44, %c5, %c0_45, %c0_46], %108 {strides = array<i32>} : memref<1x6x10x128xbf16, #tpu.memory_space<vmem>>, vector<1x1x10x128xbf16>,
    %109 = tpu.concatenate %24, %104 in 1 : vector<1x1x128xbf16>, vector<1x8x128xbf16> -> vector<1x9x128xbf16>
    %c0_47 = arith.constant 0 : index
    %c5_48 = arith.constant 5 : index
    %c0_49 = arith.constant 0 : index
    %c0_50 = arith.constant 0 : index
    %110 = vector.load %arg9[%c0_47, %c5_48, %c0_49, %c0_50] : memref<1x6x9x128xbf16, #tpu.memory_space<vmem>>, vector<1x1x9x128xbf16>
    %111 = vector.shape_cast %110 : vector<1x1x9x128xbf16> to vector<1x9x128xbf16>
    %112 = vector.shape_cast %109 : vector<1x9x128xbf16> to vector<1x1x9x128xbf16>
    tpu.vector_store %arg9[%c0_47, %c5_48, %c0_49, %c0_50], %112 {strides = array<i32>} : memref<1x6x9x128xbf16, #tpu.memory_space<vmem>>, vector<1x1x9x128xbf16>,
    %c0_51 = arith.constant 0 : index
    %c0_52 = arith.constant 0 : index
    %c0_53 = arith.constant 0 : index
    %c0_54 = arith.constant 0 : index
    %113 = vector.load %arg8[%c0_51, %c0_52, %c0_53, %c0_54] : memref<1x6x10x128xbf16, #tpu.memory_space<vmem>>, vector<1x1x9x128xbf16>
    %114 = vector.shape_cast %113 : vector<1x1x9x128xbf16> to vector<1x9x128xbf16>
    %c0_55 = arith.constant 0 : index
    %c0_56 = arith.constant 0 : index
    %c0_57 = arith.constant 0 : index
    %c0_58 = arith.constant 0 : index
    %115 = vector.load %arg9[%c0_55, %c0_56, %c0_57, %c0_58] : memref<1x6x9x128xbf16, #tpu.memory_space<vmem>>, vector<1x1x9x128xbf16>
    %116 = vector.shape_cast %115 : vector<1x1x9x128xbf16> to vector<1x9x128xbf16>
    %c0_59 = arith.constant 0 : index
    %c0_60 = arith.constant 0 : index
    %c1 = arith.constant 1 : index
    %c0_61 = arith.constant 0 : index
    %117 = vector.load %arg8[%c0_59, %c0_60, %c1, %c0_61] : memref<1x6x10x128xbf16, #tpu.memory_space<vmem>>, vector<1x1x9x128xbf16>
    %118 = vector.shape_cast %117 : vector<1x1x9x128xbf16> to vector<1x9x128xbf16>
    %c0_62 = arith.constant 0 : index
    %c1_63 = arith.constant 1 : index
    %c0_64 = arith.constant 0 : index
    %c0_65 = arith.constant 0 : index
    %119 = vector.load %arg8[%c0_62, %c1_63, %c0_64, %c0_65] : memref<1x6x10x128xbf16, #tpu.memory_space<vmem>>, vector<1x1x9x128xbf16>
    %120 = vector.shape_cast %119 : vector<1x1x9x128xbf16> to vector<1x9x128xbf16>
    %c0_66 = arith.constant 0 : index
    %c1_67 = arith.constant 1 : index
    %c0_68 = arith.constant 0 : index
    %c0_69 = arith.constant 0 : index
    %121 = vector.load %arg9[%c0_66, %c1_67, %c0_68, %c0_69] : memref<1x6x9x128xbf16, #tpu.memory_space<vmem>>, vector<1x1x9x128xbf16>
    %122 = vector.shape_cast %121 : vector<1x1x9x128xbf16> to vector<1x9x128xbf16>
    %c0_70 = arith.constant 0 : index
    %c1_71 = arith.constant 1 : index
    %c1_72 = arith.constant 1 : index
    %c0_73 = arith.constant 0 : index
    %123 = vector.load %arg8[%c0_70, %c1_71, %c1_72, %c0_73] : memref<1x6x10x128xbf16, #tpu.memory_space<vmem>>, vector<1x1x9x128xbf16>
    %124 = vector.shape_cast %123 : vector<1x1x9x128xbf16> to vector<1x9x128xbf16>
    %c0_74 = arith.constant 0 : index
    %c2_75 = arith.constant 2 : index
    %c0_76 = arith.constant 0 : index
    %c0_77 = arith.constant 0 : index
    %125 = vector.load %arg8[%c0_74, %c2_75, %c0_76, %c0_77] : memref<1x6x10x128xbf16, #tpu.memory_space<vmem>>, vector<1x1x9x128xbf16>
    %126 = vector.shape_cast %125 : vector<1x1x9x128xbf16> to vector<1x9x128xbf16>
    %c0_78 = arith.constant 0 : index
    %c2_79 = arith.constant 2 : index
    %c0_80 = arith.constant 0 : index
    %c0_81 = arith.constant 0 : index
    %127 = vector.load %arg9[%c0_78, %c2_79, %c0_80, %c0_81] : memref<1x6x9x128xbf16, #tpu.memory_space<vmem>>, vector<1x1x9x128xbf16>
    %128 = vector.shape_cast %127 : vector<1x1x9x128xbf16> to vector<1x9x128xbf16>
    %c0_82 = arith.constant 0 : index
    %c2_83 = arith.constant 2 : index
    %c1_84 = arith.constant 1 : index
    %c0_85 = arith.constant 0 : index
    %129 = vector.load %arg8[%c0_82, %c2_83, %c1_84, %c0_85] : memref<1x6x10x128xbf16, #tpu.memory_space<vmem>>, vector<1x1x9x128xbf16>
    %130 = vector.shape_cast %129 : vector<1x1x9x128xbf16> to vector<1x9x128xbf16>
    %131 = tpu.concatenate %114, %116, %118, %120, %122, %124, %126, %128, %130 in 2 : vector<1x9x128xbf16>, vector<1x9x128xbf16>, vector<1x9x128xbf16>, vector<1x9x128xbf16>, vector<1x9x128xbf16>, vector<1x9x128xbf16>, vector<1x9x128xbf16>, vector<1x9x128xbf16>, vector<1x9x128xbf16> -> vector<1x9x1152xbf16>
    %c0_86 = arith.constant 0 : index
    %c3_87 = arith.constant 3 : index
    %c0_88 = arith.constant 0 : index
    %c0_89 = arith.constant 0 : index
    %132 = vector.load %arg8[%c0_86, %c3_87, %c0_88, %c0_89] : memref<1x6x10x128xbf16, #tpu.memory_space<vmem>>, vector<1x1x9x128xbf16>
    %133 = vector.shape_cast %132 : vector<1x1x9x128xbf16> to vector<1x9x128xbf16>
    %c0_90 = arith.constant 0 : index
    %c3_91 = arith.constant 3 : index
    %c0_92 = arith.constant 0 : index
    %c0_93 = arith.constant 0 : index
    %134 = vector.load %arg9[%c0_90, %c3_91, %c0_92, %c0_93] : memref<1x6x9x128xbf16, #tpu.memory_space<vmem>>, vector<1x1x9x128xbf16>
    %135 = vector.shape_cast %134 : vector<1x1x9x128xbf16> to vector<1x9x128xbf16>
    %c0_94 = arith.constant 0 : index
    %c3_95 = arith.constant 3 : index
    %c1_96 = arith.constant 1 : index
    %c0_97 = arith.constant 0 : index
    %136 = vector.load %arg8[%c0_94, %c3_95, %c1_96, %c0_97] : memref<1x6x10x128xbf16, #tpu.memory_space<vmem>>, vector<1x1x9x128xbf16>
    %137 = vector.shape_cast %136 : vector<1x1x9x128xbf16> to vector<1x9x128xbf16>
    %c0_98 = arith.constant 0 : index
    %c4_99 = arith.constant 4 : index
    %c0_100 = arith.constant 0 : index
    %c0_101 = arith.constant 0 : index
    %138 = vector.load %arg8[%c0_98, %c4_99, %c0_100, %c0_101] : memref<1x6x10x128xbf16, #tpu.memory_space<vmem>>, vector<1x1x9x128xbf16>
    %139 = vector.shape_cast %138 : vector<1x1x9x128xbf16> to vector<1x9x128xbf16>
    %c0_102 = arith.constant 0 : index
    %c4_103 = arith.constant 4 : index
    %c0_104 = arith.constant 0 : index
    %c0_105 = arith.constant 0 : index
    %140 = vector.load %arg9[%c0_102, %c4_103, %c0_104, %c0_105] : memref<1x6x9x128xbf16, #tpu.memory_space<vmem>>, vector<1x1x9x128xbf16>
    %141 = vector.shape_cast %140 : vector<1x1x9x128xbf16> to vector<1x9x128xbf16>
    %c0_106 = arith.constant 0 : index
    %c4_107 = arith.constant 4 : index
    %c1_108 = arith.constant 1 : index
    %c0_109 = arith.constant 0 : index
    %142 = vector.load %arg8[%c0_106, %c4_107, %c1_108, %c0_109] : memref<1x6x10x128xbf16, #tpu.memory_space<vmem>>, vector<1x1x9x128xbf16>
    %143 = vector.shape_cast %142 : vector<1x1x9x128xbf16> to vector<1x9x128xbf16>
    %c0_110 = arith.constant 0 : index
    %c5_111 = arith.constant 5 : index
    %c0_112 = arith.constant 0 : index
    %c0_113 = arith.constant 0 : index
    %144 = vector.load %arg8[%c0_110, %c5_111, %c0_112, %c0_113] : memref<1x6x10x128xbf16, #tpu.memory_space<vmem>>, vector<1x1x9x128xbf16>
    %145 = vector.shape_cast %144 : vector<1x1x9x128xbf16> to vector<1x9x128xbf16>
    %c0_114 = arith.constant 0 : index
    %c5_115 = arith.constant 5 : index
    %c0_116 = arith.constant 0 : index
    %c0_117 = arith.constant 0 : index
    %146 = vector.load %arg9[%c0_114, %c5_115, %c0_116, %c0_117] : memref<1x6x9x128xbf16, #tpu.memory_space<vmem>>, vector<1x1x9x128xbf16>
    %147 = vector.shape_cast %146 : vector<1x1x9x128xbf16> to vector<1x9x128xbf16>
    %c0_118 = arith.constant 0 : index
    %c5_119 = arith.constant 5 : index
    %c1_120 = arith.constant 1 : index
    %c0_121 = arith.constant 0 : index
    %148 = vector.load %arg8[%c0_118, %c5_119, %c1_120, %c0_121] : memref<1x6x10x128xbf16, #tpu.memory_space<vmem>>, vector<1x1x9x128xbf16>
    %149 = vector.shape_cast %148 : vector<1x1x9x128xbf16> to vector<1x9x128xbf16>
    %150 = tpu.concatenate %133, %135, %137, %139, %141, %143, %145, %147, %149 in 2 : vector<1x9x128xbf16>, vector<1x9x128xbf16>, vector<1x9x128xbf16>, vector<1x9x128xbf16>, vector<1x9x128xbf16>, vector<1x9x128xbf16>, vector<1x9x128xbf16>, vector<1x9x128xbf16>, vector<1x9x128xbf16> -> vector<1x9x1152xbf16>
    %151 = tpu.concatenate %131, %150 in 1 : vector<1x9x1152xbf16>, vector<1x9x1152xbf16> -> vector<1x18x1152xbf16>
    %152 = vector.shape_cast %151 : vector<1x18x1152xbf16> to vector<18x1152xbf16>
    %c0_122 = arith.constant 0 : index
    %c0_123 = arith.constant 0 : index
    %153 = vector.load %arg5[%c0_122, %c0_123] : memref<1152x128xbf16, #tpu.memory_space<vmem>>, vector<1152x128xbf16>
    %cst_124 = arith.constant dense<0.000000e+00> : vector<18x128xf32>
    %154 = tpu.matmul %152, %153, %cst_124 {dimension_numbers = #tpu.dot_dimension_numbers<[1], [0], [0], [1], [0, 0, 1, 1], [], []>} : vector<18x1152xbf16>, vector<1152x128xbf16>, vector<18x128xf32> -> vector<18x128xf32>
    %c0_125 = arith.constant 0 : index
    %c0_126 = arith.constant 0 : index
    %155 = vector.load %arg6[%c0_125, %c0_126] : memref<1x128xf32, #tpu.memory_space<vmem>>, vector<1x128xf32>
    %156 = vector.broadcast %155 : vector<1x128xf32> to vector<18x128xf32>
    %157 = arith.addf %154, %156 : vector<18x128xf32>
    %cst_127 = arith.constant 0.000000e+00 : f32
    %158 = vector.broadcast %cst_127 : f32 to vector<18x128xf32>
    %159 = arith.maximumf %157, %158 : vector<18x128xf32>
    %160 = vector.shape_cast %159 : vector<18x128xf32> to vector<1x2x9x128xf32>
    %161 = vector.extract_strided_slice %160 {offsets = [0, 0, 0, 0], sizes = [1, 1, 9, 128], strides = [1, 1, 1, 1]} : vector<1x2x9x128xf32> to vector<1x1x9x128xf32>
    %162 = vector.shape_cast %161 : vector<1x1x9x128xf32> to vector<1x9x128xf32>
    %163 = vector.extract_strided_slice %160 {offsets = [0, 1, 0, 0], sizes = [1, 1, 9, 128], strides = [1, 1, 1, 1]} : vector<1x2x9x128xf32> to vector<1x1x9x128xf32>
    %164 = vector.shape_cast %163 : vector<1x1x9x128xf32> to vector<1x9x128xf32>
    %165 = arith.maximumf %162, %164 : vector<1x9x128xf32>
    %166 = vector.extract_strided_slice %165 {offsets = [0, 0, 0], sizes = [1, 8, 128], strides = [1, 1, 1]} : vector<1x9x128xf32> to vector<1x8x128xf32>
    %167 = vector.extract_strided_slice %165 {offsets = [0, 1, 0], sizes = [1, 8, 128], strides = [1, 1, 1]} : vector<1x9x128xf32> to vector<1x8x128xf32>
    %168 = arith.maximumf %166, %167 : vector<1x8x128xf32>
    %c0_128 = arith.constant 0 : index
    %c0_129 = arith.constant 0 : index
    %c0_130 = arith.constant 0 : index
    %c0_131 = arith.constant 0 : index
    %169 = vector.load %arg7[%c0_128, %c0_129, %c0_130, %c0_131] : memref<1x1x8x128xf32, #tpu.memory_space<vmem>>, vector<1x1x8x128xf32>
    %170 = vector.shape_cast %169 : vector<1x1x8x128xf32> to vector<1x8x128xf32>
    %171 = vector.shape_cast %168 : vector<1x8x128xf32> to vector<1x1x8x128xf32>
    tpu.vector_store %arg7[%c0_128, %c0_129, %c0_130, %c0_131], %171 {strides = array<i32>} : memref<1x1x8x128xf32, #tpu.memory_space<vmem>>, vector<1x1x8x128xf32>,
    return
  }
  func.func @transform_0(%arg0: i32) -> (i32, i32, i32) {
    %c0_i32 = arith.constant 0 : i32
    %c0_i32_0 = arith.constant 0 : i32
    %c0_i32_1 = arith.constant 0 : i32
    return %arg0, %c0_i32, %c0_i32_0 : i32, i32, i32
  }
  func.func @transform_1(%arg0: i32) -> (i32, i32, i32) {
    %c0_i32 = arith.constant 0 : i32
    %c0_i32_0 = arith.constant 0 : i32
    %c0_i32_1 = arith.constant 0 : i32
    return %arg0, %c0_i32, %c0_i32_0 : i32, i32, i32
  }
  func.func @transform_2(%arg0: i32) -> (i32, i32) {
    %c0_i32 = arith.constant 0 : i32
    %c0_i32_0 = arith.constant 0 : i32
    %c0_i32_1 = arith.constant 0 : i32
    return %c0_i32, %c0_i32_0 : i32, i32
  }
  func.func @transform_3(%arg0: i32) -> (i32, i32) {
    %c0_i32 = arith.constant 0 : i32
    %c0_i32_0 = arith.constant 0 : i32
    %c0_i32_1 = arith.constant 0 : i32
    return %c0_i32, %c0_i32_0 : i32, i32
  }
  func.func @transform_4(%arg0: i32) -> (i32, i32) {
    %c0_i32 = arith.constant 0 : i32
    %c0_i32_0 = arith.constant 0 : i32
    %c0_i32_1 = arith.constant 0 : i32
    return %c0_i32, %c0_i32_0 : i32, i32
  }
  func.func @transform_5(%arg0: i32) -> (i32, i32) {
    %c0_i32 = arith.constant 0 : i32
    %c0_i32_0 = arith.constant 0 : i32
    %c0_i32_1 = arith.constant 0 : i32
    return %c0_i32, %c0_i32_0 : i32, i32
  }
  func.func @transform_6(%arg0: i32) -> (i32, i32, i32, i32) {
    %c0_i32 = arith.constant 0 : i32
    %c0_i32_0 = arith.constant 0 : i32
    %c0_i32_1 = arith.constant 0 : i32
    %c0_i32_2 = arith.constant 0 : i32
    return %arg0, %c0_i32, %c0_i32_0, %c0_i32_1 : i32, i32, i32, i32
  }
}

</mosaic_0001>

<bundles_post_ra>
// kernel: backbone2l_forward.1
= control target key start
LH: loop header
LB: loop body
LE: loop exit
PB: predicated region body
PF: predicated region fallthrough
CT: control target
= control target key end

     0   :  { %11 = vsyncpa [#allocation5], 0  ;;  %s3353_s0 = inlined_call_operand.vmem [shape: bf16[2,128,9], index: 0, kind: input, shape index: {}]   ;;  %s3354_s1 = inlined_call_operand.vmem [shape: bf16[2,64,9], index: 1, kind: input, shape index: {}]   ;;  %s3355_s2 = inlined_call_operand.vmem [shape: bf16[9,128], index: 2, kind: input, shape index: {}]   ;;  %s3356_s3 = inlined_call_operand.vmem [shape: f32[1,128], index: 3, kind: input, shape index: {}]   ;;  %s3357_s4 = inlined_call_operand.vmem [shape: bf16[1152,128], index: 4, kind: input, shape index: {}]   ;;  %s3358_s5 = inlined_call_operand.vmem [shape: f32[1,128], index: 5, kind: input, shape index: {}]   ;;  %s3359_s6 = inlined_call_operand.hbm [shape: f32[2,1,8,128], index: 6, kind: output, shape index: {}]  }
   0x1   :  { %13 = vsyncpa [#allocation5 + $0x1], 0  ;;  %s2868_s21 = smov 0   ;;  %s2870_s22 = smov 0  }
   0x2   :  { %s2872_s23 = smov 0   ;;  %s2874_s24 = smov 0  }
   0x3 LB: > { %s2889_s25 = sadd.s32 4294967295, %s2827_s24   ;;  %s2272_s26 = sadd.s32 4294967294, %s2827_s24   ;;  %s2827_s24 = sphi %s2874_s24, %s3371_s24   ;;  %s2823_s23 = sphi %s2872_s23, %s3370_s23   ;;  %s2819_s22 = sphi %s2870_s22, %s3369_s22   ;;  %s2815_s21 = sphi %s2868_s21, %s3368_s21  }
   0x4   : > { %s2893_s27 = sadd.s32 1, %s2827_s24   ;;  %s162_s28 = sadd.s32 1, %s2823_s23 }
   0x5   : > { %s159_s29 = ssub.s32 %s2827_s24, %s2893_s27  ;;  %p172_p0 = scmp.ne.s32.totalorder %s2823_s23, %s2819_s22 }
   0x6   : > { %p160_p1 = scmp.eq.s32.totalorder %s159_s29, 0  ;;  %p173_p2 = scmp.eq.s32.totalorder %s2889_s25, 1 }
   0x7   : > { %p178_p3 = scmp.ne.s32.totalorder %s2819_s22, %s2815_s21  ;;  %p179_p4 = scmp.eq.s32.totalorder %s2272_s26, 1 }
   0x8   : > { %s2904_s30 = scalar_select %p160_p1, %s2823_s23, %s162_s28  }
   0x9   : > { %p2906_p5 = por %p173_p2, %p172_p0  ;;  %p2910_p6 = por %p179_p4, %p178_p3 }
   0xa   : > { %p2275_p7 = scmp.ge.s32.totalorder %s2827_s24, 1  ;;  %p225_p8 = scmp.lt.s32.totalorder %s2827_s24, 3 }
   0xc   : > { %p226_p9 = pnand %p2275_p7, %p225_p8 }
   0xd   : > { %v2668_v0 = vld [vmem:[%s3355_s2] sm:$0x1f] (!%p226_p9)   ;;  %vm374_vm0 = vcmask (!%p226_p9), 1043456   ;;  %vm375_vm1 = vcmask (!%p226_p9), 1044480   ;;  %p260_p10 = scmp.lt.s32.totalorder (!%p226_p9), %s2889_s25, 1  ;;  %v2829_v1 = vmov (!%p226_p9), 65535  }
   0xe   : > { %229 = sbr.rel (%p226_p9) target bundleno = 625 (0x271), region = 44  ;;  %v376_v2 = vsel (!%p226_p9), %vm374_vm0, 4294967295, %v2829_v1  ;;  %vm349_vm2 = vcmask (!%p226_p9), 72704   ;;  %v2681_v17 = vld [vmem:[%s3357_s4 + $0xc0] sm:$0xff] (!%p226_p9)   ;;  %v2683_v19 = vld [vmem:[%s3357_s4 + $0xc8] sm:$0xff] (!%p226_p9)   ;;  %v2687_v23 = vld [vmem:[%s3357_s4 + $0xd0] sm:$0xff] (!%p226_p9)  }
   0xf   : > { %v377_v3 = vsel (!%p226_p9), %vm375_vm1, %v376_v2, 0  ;;  %v2682_v18 = vld [vmem:[%s3357_s4 + $0x80] sm:$0xff] (!%p226_p9)   ;;  %v2685_v21 = vld [vmem:[%s3357_s4 + $0x88] sm:$0xff] (!%p226_p9)   ;;  %v2689_v25 = vld [vmem:[%s3357_s4 + $0x90] sm:$0xff] (!%p226_p9)   ;;  %v2830_v32 = vmov (!%p226_p9), 0   ;;  %vm644_vm3 = vcmask (!%p226_p9), 1040384  }
  0x10   : > { %v379_v4 = vand.u32 (!%p226_p9), %v2668_v0, %v377_v3  ;;  %v2684_v20 = vld [vmem:[%s3357_s4 + $0x40] sm:$0xff] (!%p226_p9)   ;;  %v2688_v24 = vld [vmem:[%s3357_s4 + $0x48] sm:$0xff] (!%p226_p9)   ;;  %v2691_v27 = vld [vmem:[%s3357_s4 + $0xd8] sm:$0xff] (!%p226_p9)   ;;  %641 = vst [vmem:[#allocation2 + $0x8] sm:$0xf] (!%p226_p9), %v2830_v32  ;;  %s257_s18 = sand.u32 (!%p226_p9), 1, %s2819_s22  }
  0x11   : > { %v2686_v22 = vld [vmem:[%s3357_s4] sm:$0xff] (!%p226_p9)   ;;  %v2690_v26 = vld [vmem:[%s3357_s4 + $0x8] sm:$0xff] (!%p226_p9)   ;;  %v2692_v28 = vld [vmem:[%s3357_s4 + $0x50] sm:$0xff] (!%p226_p9)   ;;  %642 = vst [vmem:[#allocation2 + $0xc] sm:$0x1] (!%p226_p9), %v2830_v32  ;;  %s2429_s20 = sshll.u32 (!%p226_p9), %s2889_s25, 7 }
  0x12   : > { %2578 = vmatprep.subr.bf16.mxu0 (!%p226_p9), %v379_v4  ;;  %2596 = vmatprep.subr.bf16.mxu1 (!%p226_p9), %v379_v4  ;;  %v2693_v29 = vld [vmem:[%s3357_s4 + $0x98] sm:$0xff] (!%p226_p9)   ;;  %v2694_v30 = vld [vmem:[%s3357_s4 + $0x10] sm:$0xff] (!%p226_p9)   ;;  %v2695_v31 = vld [vmem:[%s3357_s4 + $0xe0] sm:$0xff] (!%p226_p9)   ;;  %639 = vst [vmem:[#allocation2] sm:$0xf] (!%p226_p9), %v2830_v32  ;;  %s3311_s10 = scalar_lea.hbm (!%p226_p9), %s3359_s6, %s2429_s20 }
  0x13   : > { %2579 = vmatpush3.bf16.msra.mxu0 (!%p226_p9), %v379_v4  ;;  %2597 = vmatpush3.bf16.msra.mxu1 (!%p226_p9), %v379_v4  ;;  %640 = vst [vmem:[#allocation2 + $0x4] sm:$0x1] (!%p226_p9), %v2830_v32  ;;  %643 = vst [vmem:[#allocation3] sm:$0xf] (!%p226_p9), %v2830_v32  ;;  %v2696_v33 = vld [vmem:[%s3357_s4 + $0x58] sm:$0xff] (!%p226_p9)   ;;  %v2697_v34 = vld [vmem:[%s3357_s4 + $0xa0] sm:$0xff] (!%p226_p9)  }
  0x14   : > { %2484 = vmatprep.subr.bf16.mxu1 (!%p226_p9), %v2681_v17  ;;  %2456 = vmatprep.subr.bf16.mxu0 (!%p226_p9), %v2684_v20  ;;  %650 = vst [vmem:[#allocation3 + $0x8] sm:$0xf] (!%p226_p9), %v2830_v32  ;;  %v2698_v35 = vld [vmem:[%s3357_s4 + $0x18] sm:$0xff] (!%p226_p9)   ;;  %v2699_v36 = vld [vmem:[%s3357_s4 + $0xe8] sm:$0xff] (!%p226_p9)   ;;  %v2700_v37 = vld [vmem:[%s3357_s4 + $0x60] sm:$0xff] (!%p226_p9)  }
  0x15   : > { %s261_s11 = scalar_select %p260_p10, %s2889_s25, 1  ;;  %v2701_v38 = vld [vmem:[%s3357_s4 + $0xa8] sm:$0xff]   ;;  %v2702_v39 = vld [vmem:[%s3357_s4 + $0x20] sm:$0xff]   ;;  %v2703_v40 = vld [vmem:[%s3357_s4 + $0xf0] sm:$0xff]   ;;  %vm645_vm4 = vsmask.f32 256 }
  0x16   : > { %v2704_v41 = vld [vmem:[%s3357_s4 + $0x68] sm:$0xff]   ;;  %v2705_v42 = vld [vmem:[%s3357_s4 + $0xb0] sm:$0xff]   ;;  %vm3018_vm5 = vmand %vm644_vm3, %vm645_vm4  ;;  %vm691_vm6 = vsmask.f32 4352  ;;  %vm662_vm7 = vsmask.f32 3328 }
  0x17   : > { %s2432_s12 = sshll.u32 %s261_s11, 6  ;;  %s2433_s13 = sshll.u32 %s261_s11, 5  ;;  %v2706_v43 = vld [vmem:[%s3357_s4 + $0x28] sm:$0xff]   ;;  %v2707_v45 = vld [vmem:[%s3357_s4 + $0xf8] sm:$0xff]   ;;  %v647_v46 = vld [vmem:[#allocation3 + $0x4] sm:$0x1] }
  0x18   : > { %s264_s16 = scalar_lea.vmem %s3353_s0, %s2432_s12  ;;  %s269_s19 = scalar_lea.vmem %s3354_s1, %s2433_s13  ;;  %v2708_v47 = vld [vmem:[%s3357_s4 + $0x70] sm:$0xff]   ;;  %v2709_v48 = vld [vmem:[%s3357_s4 + $0xb8] sm:$0xff]   ;;  %v648_v49 = vsel %vm3018_vm5, 0, %v647_v46  ;;  %v2713_v51 = vld [vmem:[%s3357_s4 + $0x1c0] sm:$0xff]   ;;  %vm663_vm8 = vsmask.f32 7440 }
  0x19   : > { %v2669_v5 = vld [vmem:[%s264_s16] sm:$0xff]   ;;  %v2671_v7 = vld [vmem:[%s264_s16 + $0x8] sm:$0xff]   ;;  %v2673_v9 = vld [vmem:[%s264_s16 + $0x10] sm:$0xff]   ;;  %649 = vst [vmem:[#allocation3 + $0x4] sm:$0x1] %v648_v49  ;;  %s2188_s11 = scalar_lea.sflag [#allocation5], %s257_s18 }
  0x1a   : > { %v2670_v6 = vld [vmem:[%s269_s19] sm:$0xff]   ;;  %2580 = vmatprep.mubr.msk.bf16.mxu0 %vm349_vm2, %v2669_v5  ;;  %v2672_v8 = vld [vmem:[%s269_s19 + $0x8] sm:$0xff]   ;;  %v2674_v10 = vld [vmem:[%s264_s16 + $0x18] sm:$0xff]   ;;  %s2832_s12 = smov [#allocation4]  }
  0x1b   : > { %2598 = vmatprep.mubr.msk.bf16.mxu1 %vm349_vm2, %v2670_v6  ;;  %2581 = vmatmul.mubr.msk.bf16.vlgmr.msra.gmra.mrb[0].mxu0 %vm349_vm2, %v2671_v7  ;;  %v2676_v11 = vld [vmem:[%s269_s19 + $0x10] sm:$0xff]   ;;  %v2675_v12 = vld [vmem:[%s264_s16 + $0x20] sm:$0xff]   ;;  %v2678_v13 = vld [vmem:[%s269_s19 + $0x18] sm:$0xff]   ;;  %s2276_s19 = sshll.u32 %s257_s18, 3  ;;  %s2769_s13 = sshll.u32 %s2832_s12, 4  ;;  %s2770_s13 = int_to_ptr.vmem [resolvable:$false] %s2769_s13 }
  0x1c   : > { %2599 = vmatmul.mubr.msk.bf16.vlgmr.msra.gmra.mrb[0].mxu1 %vm349_vm2, %v2672_v8  ;;  %2584 = vmatprep.mubr.msk.bf16.mxu0 %vm349_vm2, %v2673_v9  ;;  %v2677_v14 = vld [vmem:[%s264_s16 + $0x28] sm:$0xff]   ;;  %v2679_v15 = vld [vmem:[%s264_s16 + $0x30] sm:$0xff]   ;;  %v2680_v16 = vld [vmem:[%s264_s16 + $0x38] sm:$0xff]   ;;  %s259_s26 = scalar_lea.vmem [#allocation4], %s2276_s19  ;;  %s2771_s14 = scalar_lea.vmem %s2770_s13, 256 }
  0x1d   : > { %2602 = vmatprep.mubr.msk.bf16.mxu1 %vm349_vm2, %v2676_v11  ;;  %2485 = vmatpush3.bf16.msra.mxu1 %v2682_v18  ;;  %v2710_v50 = vld [vmem:[%s3357_s4 + $0x30] sm:$0xff]   ;;  %v2714_v52 = vld [vmem:[%s3357_s4 + $0x78] sm:$0xff]   ;;  %v2722_v54 = vld [vmem:[%s3357_s4 + $0x140] sm:$0xff]   ;;  %s2201_s28 = sshll.u32 %s259_s26, 4  ;;  %s3313_s28 = int_to_ptr.vmem [resolvable:$true] %s2201_s28 }
  0x1e   : > { %2486 = vmatprep.subr.bf16.mxu1 %v2683_v19  ;;  %2457 = vmatpush3.bf16.msra.mxu0 %v2686_v22  ;;  %v2718_v53 = vld [vmem:[%s3357_s4 + $0x38] sm:$0xff]   ;;  %v3053_v57 = vld [vmem:[%s3356_s3] ss:$0 sm:$0xff]  ;;  %vm3075_vm9 = vmand %vm375_vm1, %vm691_vm6  ;;  %s2765_s25 = scalar_lea.vmem %s3313_s28, 128  ;;  %p2772_p0 = scmp.lt.s32.totalorder %s3313_s28, %s2770_s13 }
  0x1f   : > { %2458 = vmatprep.subr.bf16.mxu0 %v2688_v24  ;;  %v651_v55 = vld [vmem:[#allocation3 + $0xc] sm:$0x1]  ;;  %vm3082_vm10 = vmor %vm662_vm7, %vm663_vm8  ;;  %v2727_v44 = vld [vmem:[%s3357_s4 + $0x190] sm:$0xff]   ;;  %p2766_p11 = scmp.ne.s32.totalorder %s3313_s28, %s2765_s25  ;;  %p2773_p1 = scmp.lt.s32.totalorder %s2771_s14, %s2765_s25 }
  0x20   : > { %v652_v56 = vsel %vm3018_vm5, 0, %v651_v55 }
  0x21   : > { %2487 = vmatpush3.bf16.msra.mxu1 %v2685_v21  ;;  %653 = vst [vmem:[#allocation3 + $0xc] sm:$0x1] %v652_v56  ;;  %p2767_p12 = pnand %p2766_p11, %p2906_p5  ;;  %p2774_p2 = por %p2773_p1, %p2772_p0 }
  0x22   : > { %2488 = vmatprep.subr.bf16.mxu1 %v2687_v23  ;;  %2459 = vmatpush3.bf16.msra.mxu0 %v2690_v26 }
  0x23   : > { %2585 = vmatmul.mubr.msk.bf16.gmra.mrb[4].mxu0 %vm349_vm2, %v2674_v10  ;;  %2460 = vmatprep.subr.bf16.mxu0 %v2692_v28  ;;  %p2768_p13 = pneg %p2767_p12 }
  0x24   : > { %2588 = vmatprep.mubr.msk.bf16.mxu0 %vm349_vm2, %v2675_v12  ;;  %2603 = vmatmul.mubr.msk.bf16.gmra.mrb[4].mxu1 %vm349_vm2, %v2678_v13 }
  0x25   : > { %2489 = vmatpush3.bf16.msra.mxu1 %v2689_v25  ;;  %p2775_p3 = pnand %p2774_p2, %p2768_p13 }
  0x26   : > { %2490 = vmatprep.subr.bf16.mxu1 %v2691_v27  ;;  %2461 = vmatpush3.bf16.msra.mxu0 %v2694_v30 }
  0x27   : > { %2462 = vmatprep.subr.bf16.mxu0 %v2696_v33 }
  0x29   : > { %2491 = vmatpush3.bf16.msra.mxu1 %v2693_v29 }
  0x2a   : > { %2492 = vmatprep.subr.bf16.mxu1 %v2695_v31  ;;  %2463 = vmatpush3.bf16.msra.mxu0 %v2698_v35 }
  0x2b   : > { %2589 = vmatmul.mubr.msk.bf16.gmra.mrb[8].mxu0 %vm349_vm2, %v2677_v14  ;;  %2464 = vmatprep.subr.bf16.mxu0 %v2700_v37 }
  0x2c   : > { %2592 = vmatprep.mubr.msk.bf16.mxu0 %vm349_vm2, %v2679_v15 }
  0x2d   : > { %2493 = vmatpush3.bf16.msra.mxu1 %v2697_v34 }
  0x2e   : > { %2494 = vmatprep.subr.bf16.mxu1 %v2699_v36  ;;  %2465 = vmatpush3.bf16.msra.mxu0 %v2702_v39 }
  0x2f   : > { %2466 = vmatprep.subr.bf16.mxu0 %v2704_v41 }
  0x31   : > { %2495 = vmatpush3.bf16.msra.mxu1 %v2701_v38 }
  0x32   : > { %2496 = vmatprep.subr.bf16.mxu1 %v2703_v40  ;;  %2467 = vmatpush3.bf16.msra.mxu0 %v2706_v43 }
  0x33   : > { %2593 = vmatmul.mubr.msk.bf16.gmra.mrb[12].mxu0 %vm349_vm2, %v2680_v16  ;;  %2468 = vmatprep.subr.bf16.mxu0 %v2708_v47 }
  0x35   : > { %2497 = vmatpush3.bf16.msra.mxu1 %v2705_v42 }
  0x36   : > { %2498 = vmatprep.subr.bf16.mxu1 %v2707_v45  ;;  %2469 = vmatpush3.bf16.msra.mxu0 %v2710_v50 }
  0x37   : > { %2470 = vmatprep.subr.bf16.mxu0 %v2714_v52 }
  0x39   : > { %2499 = vmatpush3.bf16.msra.mxu1 %v2709_v48 }
  0x3a   : > { %2540 = vmatprep.subr.bf16.mxu1 %v2713_v51  ;;  %2471 = vmatpush3.bf16.msra.mxu0 %v2718_v53 }
  0x3b   : > { %2512 = vmatprep.subr.bf16.mxu0 %v2722_v54 }
  0xee   : > { %v2582_v58 = vpop.f32.mrb[0].mxu0 }
  0xef   : > { %v424_v59 = vadd.f32 %v2582_v58, %v3053_v57  ;;  %v2600_v60 = vpop.f32.mrb[0].mxu1  ;;  %v415_v61 = vpop.f32.mrb[1].mxu0 }
  0xf0   : > { %v577_v62 = vadd.f32 %v2600_v60, %v3053_v57  ;;  %v416_v63 = vadd.f32 %v3053_v57, %v415_v61  ;;  %v568_v0 = vpop.f32.mrb[1].mxu1  ;;  %v2583_v1 = vpop.f32.mrb[2].mxu0 }
  0xf1   : > { %v569_v2 = vadd.f32 %v3053_v57, %v568_v0  ;;  %v427_v3 = vadd.f32 %v2583_v1, %v3053_v57  ;;  %v2601_v4 = vpop.f32.mrb[2].mxu1  ;;  %v418_v5 = vpop.f32.mrb[3].mxu0  ;;  %v480_v10 = vmax.f32 %v424_v59, 0.0 }
  0xf2   : > { %v601_v6 = vmax.f32 %v577_v62, 0.0  ;;  %v580_v7 = vadd.f32 %v2601_v4, %v3053_v57  ;;  %v419_v8 = vadd.f32 %v3053_v57, %v418_v5  ;;  %v571_v9 = vpop.f32.mrb[3].mxu1  ;;  %v478_v15 = vmax.f32 %v416_v63, 0.0  ;;  %v2763_v4 = vld [vmem:[%s3357_s4 + $0x230] sm:$0xff]  }
  0xf3   : > { %v599_v11 = vmax.f32 %v569_v2, 0.0  ;;  %v481_v12 = vmax.f32 %v427_v3, 0.0  ;;  %v572_v13 = vadd.f32 %v3053_v57, %v571_v9 }
  0xf4   : > { %v2436_v14 = vpack.c.bf16 %v601_v6, %v601_v6  ;;  %v602_v16 = vmax.f32 %v580_v7, 0.0  ;;  %v479_v17 = vmax.f32 %v419_v8, 0.0 }
  0xf5   : > { %v2434_v18 = vpack.c.bf16 %v599_v11, %v599_v11  ;;  %v495_v19 = vpack.c.bf16 %v481_v12, %v480_v10  ;;  %v600_v20 = vmax.f32 %v572_v13, 0.0 }
  0xf6   : > { %v2437_v21 = vpack.c.bf16 %v602_v16, %v602_v16  ;;  %v494_v22 = vpack.c.bf16 %v479_v17, %v478_v15  ;;  %v2586_v23 = vpop.f32.mrb[4].mxu0 }
  0xf7   : > { %v2435_v24 = vpack.c.bf16 %v600_v20, %v600_v20  ;;  %v440_v25 = vadd.f32 %v2586_v23, %v3053_v57  ;;  %v431_v26 = vpop.f32.mrb[5].mxu0  ;;  %v2604_v27 = vpop.f32.mrb[4].mxu1 }
  0xf8   : > { %v3064_v28 = vmax.bf16 %v2437_v21, %v2436_v14  ;;  %v654_v29 = vmax.bf16 %v495_v19, %v494_v22  ;;  %v432_v30 = vadd.f32 %v3053_v57, %v431_v26  ;;  %v2587_v31 = vpop.f32.mrb[6].mxu0  ;;  %v593_v32 = vadd.f32 %v2604_v27, %v3053_v57  ;;  %v584_v33 = vpop.f32.mrb[5].mxu1 }
  0xf9   : > { %v655_v34 = vmax.bf16 %v2435_v24, %v2434_v18  ;;  %v484_v35 = vmax.f32 %v440_v25, 0.0  ;;  %v443_v36 = vadd.f32 %v2587_v31, %v3053_v57  ;;  %v434_v37 = vpop.f32.mrb[7].mxu0  ;;  %v585_v38 = vadd.f32 %v3053_v57, %v584_v33  ;;  %v2605_v39 = vpop.f32.mrb[6].mxu1 }
  0xfa   : > { %v2315_v40 = vcombine.low %v654_v29, %v654_v29  ;;  %v2316_v41 = vcombine.high %v654_v29, %v654_v29  ;;  %v482_v42 = vmax.f32 %v432_v30, 0.0  ;;  %v435_v43 = vadd.f32 %v3053_v57, %v434_v37  ;;  %v587_v45 = vpop.f32.mrb[7].mxu1 }
  0xfb   : > { %v656_v46 = vmax.bf16 %v655_v34, %v654_v29  ;;  %v485_v47 = vmax.f32 %v443_v36, 0.0  ;;  %v605_v48 = vmax.f32 %v593_v32, 0.0  ;;  %v603_v49 = vmax.f32 %v585_v38, 0.0 }
  0xfc   : > { %v666_v50 = vshrl.u32 %v2315_v40, 16  ;;  %v669_v51 = vshll.u32 %v2315_v40, 16  ;;  %v675_v52 = vshll.u32 %v2316_v41, 16  ;;  %v483_v53 = vmax.f32 %v435_v43, 0.0 }
  0xfd   : > { %v682_v54 = vshrl.u32 %v656_v46, 16  ;;  %v685_v55 = vshll.u32 %v656_v46, 16  ;;  %v497_v56 = vpack.c.bf16 %v485_v47, %v484_v35  ;;  %v2440_v62 = vpack.c.bf16 %v605_v48, %v605_v48 }
  0xfe   : > { %v668_v58 = vrot.slane %v666_v50, 4  ;;  %v671_v59 = vrot.slane %v669_v51, 5  ;;  %v496_v60 = vpack.c.bf16 %v483_v53, %v482_v42  ;;  %v2590_v61 = vpop.f32.mrb[8].mxu0  ;;  %v677_v63 = vrot.slane %v675_v52, 5 }
  0xff   : > { %v684_v0 = vrot.slane %v682_v54, 7  ;;  %v456_v1 = vadd.f32 %v2590_v61, %v3053_v57  ;;  %v447_v2 = vpop.f32.mrb[9].mxu0  ;;  %v596_v3 = vadd.f32 %v2605_v39, %v3053_v57  ;;  %v2438_v8 = vpack.c.bf16 %v603_v49, %v603_v49 }
 0x100   : > { %v672_v5 = vor.u32 %v671_v59, %v668_v58  ;;  %v728_v6 = vmax.bf16 %v497_v56, %v496_v60  ;;  %v448_v7 = vadd.f32 %v3053_v57, %v447_v2  ;;  %v2591_v9 = vpop.f32.mrb[10].mxu0  ;;  %v588_v15 = vadd.f32 %v3053_v57, %v587_v45 }
 0x101   : > { %v687_v11 = vor.u32 %v685_v55, %v684_v0  ;;  %v459_v12 = vadd.f32 %v2591_v9, %v3053_v57  ;;  %v606_v13 = vmax.f32 %v596_v3, 0.0  ;;  %v450_v14 = vpop.f32.mrb[11].mxu0  ;;  %v488_v21 = vmax.f32 %v456_v1, 0.0 }
 0x102   : > { %v673_v16 = vrot.slane %v672_v5, 4  ;;  %v730_v17 = vmax.bf16 %v3064_v28, %v728_v6  ;;  %v2322_v18 = vcombine.low %v728_v6, %v728_v6  ;;  %v2323_v19 = vcombine.high %v728_v6, %v728_v6 }
 0x103   : > { %v689_v20 = vsel %vm3018_vm5, 0, %v687_v11  ;;  %v489_v22 = vmax.f32 %v459_v12, 0.0  ;;  %v2441_v23 = vpack.c.bf16 %v606_v13, %v606_v13  ;;  %v486_v37 = vmax.f32 %v448_v7, 0.0 }
 0x104   : > { %v678_v24 = vsel %vm3082_vm10, %v673_v16, %v677_v63  ;;  %v693_v25 = vsel %vm3075_vm9, %v689_v20, 0  ;;  %v737_v26 = vshrl.u32 %v2322_v18, 16  ;;  %v740_v27 = vshll.u32 %v2322_v18, 16 }
 0x105   : > { %v680_v29 = vmax.bf16 %v678_v24, %v655_v34  ;;  %v2317_v30 = vcombine.low %v693_v25, %v693_v25  ;;  %v2318_v31 = vcombine.high %v693_v25, %v693_v25  ;;  %v746_v32 = vshll.u32 %v2323_v19, 16 }
 0x106   : > { %v739_v33 = vrot.slane %v737_v26, 4  ;;  %v742_v35 = vrot.slane %v740_v27, 5  ;;  %v753_v36 = vshrl.u32 %v730_v17, 16  ;;  %v2594_v38 = vpop.f32.mrb[12].mxu0  ;;  %v756_v40 = vshll.u32 %v730_v17, 16 }
 0x107   : > { %702 = vst [vmem:[#allocation2 + $0x10] sm:$0xf] %v2317_v30  ;;  %703 = vst [vmem:[#allocation2 + $0x14] sm:$0x1] %v2318_v31  ;;  %v2319_v39 = vcombine.low %v680_v29, %v680_v29  ;;  %v499_v41 = vpack.c.bf16 %v489_v22, %v488_v21  ;;  %v3095_v42 = vmax.bf16 %v2441_v23, %v2440_v62  ;;  %v463_v43 = vpop.f32.mrb[13].mxu0  ;;  %v604_v47 = vmax.f32 %v588_v15, 0.0 }
 0x108   : > { %v743_v45 = vor.u32 %v742_v35, %v739_v33  ;;  %v755_v46 = vrot.slane %v753_v36, 7  ;;  %v451_v34 = vadd.f32 %v3053_v57, %v450_v14  ;;  %v2595_v48 = vpop.f32.mrb[14].mxu0  ;;  %v748_v51 = vrot.slane %v746_v32, 5  ;;  %v725_v15 = vld [vmem:[#allocation3 + $0x14] sm:$0x1] }
 0x109   : > { %v708_v49 = vshrl.u32 %v2319_v39, 16  ;;  %v711_v50 = vshll.u32 %v2319_v39, 16  ;;  %v472_v52 = vadd.f32 %v2594_v38, %v3053_v57  ;;  %v466_v53 = vpop.f32.mrb[15].mxu0  ;;  %v2439_v58 = vpack.c.bf16 %v604_v47, %v604_v47  ;;  %v793_v39 = vld [vmem:[#allocation3 + $0x1c] sm:$0x1] }
 0x10a   : > { %v744_v54 = vrot.slane %v743_v45, 4  ;;  %v758_v55 = vor.u32 %v756_v40, %v755_v46  ;;  %v487_v56 = vmax.f32 %v451_v34, 0.0  ;;  %v464_v61 = vadd.f32 %v3053_v57, %v463_v43 }
 0x10b   : > { %v710_v59 = vrot.slane %v708_v49, 7  ;;  %v492_v60 = vmax.f32 %v472_v52, 0.0  ;;  %v475_v62 = vadd.f32 %v2595_v48, %v3053_v57  ;;  %v797_v2 = vmax.bf16 %v2439_v58, %v2438_v8 }
 0x10c   : > { %v749_v63 = vsel %vm3082_vm10, %v744_v54, %v748_v51  ;;  %v760_v0 = vsel %vm3018_vm5, 0, %v758_v55  ;;  %v498_v1 = vpack.c.bf16 %v487_v56, %v486_v37  ;;  %v467_v13 = vadd.f32 %v3053_v57, %v466_v53  ;;  %v3116_v51 = vld [vmem:[#allocation2] sm:$0x1f]  }
 0x10d   : > { %v713_v3 = vor.u32 %v711_v50, %v710_v59  ;;  %v751_v5 = vmax.bf16 %v749_v63, %v3064_v28  ;;  %v761_v6 = vsel %vm3075_vm9, %v760_v0, 0  ;;  %v493_v7 = vmax.f32 %v475_v62, 0.0 }
 0x10e   : > { %v2324_v9 = vcombine.low %v761_v6, %v761_v6  ;;  %v2325_v11 = vcombine.high %v761_v6, %v761_v6  ;;  %v796_v12 = vmax.bf16 %v499_v41, %v498_v1  ;;  %v490_v17 = vmax.f32 %v464_v61, 0.0 }
 0x10f   : > { %v715_v14 = vsel %vm3018_vm5, 0, %v713_v3  ;;  %v2326_v16 = vcombine.low %v751_v5, %v751_v5  ;;  %v501_v18 = vpack.c.bf16 %v493_v7, %v492_v60  ;;  %v491_v24 = vmax.f32 %v467_v13, 0.0 }
 0x110   : > { %v2320_v8 = vcombine.low %v715_v14, %v715_v14  ;;  %v2321_v19 = vcombine.high %v715_v14, %v715_v14  ;;  %770 = vst [vmem:[#allocation2 + $0x18] sm:$0xf] %v2324_v9  ;;  %771 = vst [vmem:[#allocation2 + $0x1c] sm:$0x1] %v2325_v11  ;;  %v2329_v28 = vcombine.low %v796_v12, %v796_v12  ;;  %v961_v7 = vshll.u32 %v3116_v51, 16 }
 0x111   : > { %v2330_v20 = vcombine.high %v796_v12, %v796_v12  ;;  %v776_v21 = vshrl.u32 %v2326_v16, 16  ;;  %v779_v22 = vshll.u32 %v2326_v16, 16  ;;  %v798_v23 = vmax.bf16 %v797_v2, %v796_v12 }
 0x112   : > { %724 = vst [vmem:[#allocation3 + $0x10] sm:$0xf] %v2320_v8  ;;  %v726_v57 = vsel %vm3018_vm5, %v2321_v19, %v725_v15  ;;  %v805_v25 = vshrl.u32 %v2329_v28, 16  ;;  %v808_v26 = vshll.u32 %v2329_v28, 16  ;;  %v500_v32 = vpack.c.bf16 %v491_v24, %v490_v17 }
 0x113   : > { %v814_v27 = vshll.u32 %v2330_v20, 16  ;;  %727 = vst [vmem:[#allocation3 + $0x14] sm:$0x1] %v726_v57  ;;  %v778_v29 = vrot.slane %v776_v21, 7  ;;  %v821_v30 = vshrl.u32 %v798_v23, 16  ;;  %v824_v31 = vshll.u32 %v798_v23, 16 }
 0x114   : > { %v807_v33 = vrot.slane %v805_v25, 4  ;;  %v810_v35 = vrot.slane %v808_v26, 5  ;;  %v864_v38 = vmax.bf16 %v501_v18, %v500_v32  ;;  %v959_v19 = vshrl.u32 %v3116_v51, 16 }
 0x115   : > { %v781_v36 = vor.u32 %v779_v22, %v778_v29  ;;  %v823_v37 = vrot.slane %v821_v30, 7  ;;  %v816_v40 = vrot.slane %v814_v27, 5  ;;  %v963_v28 = vrot.slane %v961_v7, 1 }
 0x116   : > { %v811_v41 = vor.u32 %v810_v35, %v807_v33  ;;  %v866_v46 = vmax.bf16 %v3095_v42, %v864_v38  ;;  %v2336_v34 = vcombine.low %v864_v38, %v864_v38  ;;  %v2337_v50 = vcombine.high %v864_v38, %v864_v38 }
 0x117   : > { %v783_v43 = vsel %vm3018_vm5, 0, %v781_v36  ;;  %v826_v45 = vor.u32 %v824_v31, %v823_v37  ;;  %v2716_v52 = vld [vmem:[#allocation2 + $0x18] sm:$0x1f]   ;;  %v964_v33 = vor.u32 %v963_v28, %v959_v19  ;;  %v861_v36 = vld [vmem:[#allocation3 + $0x24] sm:$0x1] }
 0x118   : > { %v2327_v47 = vcombine.low %v783_v43, %v783_v43  ;;  %v2328_v48 = vcombine.high %v783_v43, %v783_v43  ;;  %v812_v49 = vrot.slane %v811_v41, 4  ;;  %v873_v54 = vshrl.u32 %v2336_v34, 16 }
 0x119   : > { %v828_v53 = vsel %vm3018_vm5, 0, %v826_v45  ;;  %v876_v55 = vshll.u32 %v2336_v34, 16  ;;  %v889_v56 = vshrl.u32 %v866_v46, 16  ;;  %v882_v61 = vshll.u32 %v2337_v50, 16 }
 0x11a   : > { %792 = vst [vmem:[#allocation3 + $0x18] sm:$0xf] %v2327_v47  ;;  %v794_v58 = vsel %vm3018_vm5, %v2328_v48, %v793_v39  ;;  %v817_v59 = vsel %vm3082_vm10, %v812_v49, %v816_v40  ;;  %v829_v60 = vsel %vm3075_vm9, %v828_v53, 0  ;;  %v875_v1 = vrot.slane %v873_v54, 4  ;;  %v2711_v48 = vld [vmem:[#allocation2 + $0x8] sm:$0x1f]  }
 0x11b   : > { %795 = vst [vmem:[#allocation3 + $0x1c] sm:$0x1] %v794_v58  ;;  %v819_v62 = vmax.bf16 %v817_v59, %v797_v2  ;;  %v2331_v63 = vcombine.low %v829_v60, %v829_v60  ;;  %v2332_v0 = vcombine.high %v829_v60, %v829_v60  ;;  %v878_v3 = vrot.slane %v876_v55, 5  ;;  %v2717_v59 = vld [vmem:[%s3357_s4 + $0x180] sm:$0xff]   ;;  %v2720_v60 = vld [vmem:[#allocation3] sm:$0x1f]  }
 0x11c   : > { %v891_v5 = vrot.slane %v889_v56, 7  ;;  %v892_v6 = vshll.u32 %v866_v46, 16  ;;  %v1031_v11 = vshll.u32 %v2716_v52, 16  ;;  %v884_v13 = vrot.slane %v882_v61, 5 }
 0x11d   : > { %838 = vst [vmem:[#allocation2 + $0x20] sm:$0xf] %v2331_v63  ;;  %839 = vst [vmem:[#allocation2 + $0x24] sm:$0x1] %v2332_v0  ;;  %v2333_v9 = vcombine.low %v819_v62, %v819_v62  ;;  %v879_v12 = vor.u32 %v878_v3, %v875_v1  ;;  %v1029_v15 = vshrl.u32 %v2716_v52, 16  ;;  %v981_v0 = vshll.u32 %v2711_v48, 16 }
 0x11e   : > { %v894_v14 = vor.u32 %v892_v6, %v891_v5  ;;  %v1033_v18 = vrot.slane %v1031_v11, 1  ;;  %v1070_v34 = vrot.slane %v1031_v11, 4  ;;  %v2719_v3 = vld [vmem:[%s3357_s4 + $0x1c8] sm:$0xff]   ;;  %v929_v11 = vld [vmem:[#allocation3 + $0x2c] sm:$0x1] }
 0x11f   : > { %v844_v16 = vshrl.u32 %v2333_v9, 16  ;;  %v847_v17 = vshll.u32 %v2333_v9, 16  ;;  %v880_v2 = vrot.slane %v879_v12, 4  ;;  %v1069_v25 = vrot.slane %v1029_v15, 3 }
 0x120   : > { %v896_v8 = vsel %vm3018_vm5, 0, %v894_v14  ;;  %v1034_v22 = vor.u32 %v1033_v18, %v1029_v15  ;;  %v979_v18 = vshrl.u32 %v2711_v48, 16  ;;  %v983_v19 = vrot.slane %v981_v0, 1  ;;  %v2750_v0 = vld [vmem:[%s3357_s4 + $0x130] sm:$0xff]  }
 0x121   : > { %v846_v20 = vrot.slane %v844_v16, 7  ;;  %v897_v21 = vsel %vm3075_vm9, %v896_v8, 0  ;;  %v885_v23 = vsel %vm3082_vm10, %v880_v2, %v884_v13  ;;  %v1071_v5 = vor.u32 %v1070_v34, %v1069_v25  ;;  %v2723_v16 = vld [vmem:[%s3357_s4 + $0x188] sm:$0xff]  }
 0x122   : > { %v2338_v24 = vcombine.low %v897_v21, %v897_v21  ;;  %v2339_v57 = vcombine.high %v897_v21, %v897_v21  ;;  %v887_v27 = vmax.bf16 %v885_v23, %v3095_v42  ;;  %v1081_v29 = vshrl.u32 %v1034_v22, 16  ;;  %v2721_v31 = vld [vmem:[#allocation3 + $0x18] sm:$0x1f]   ;;  %v2725_v23 = vld [vmem:[%s3357_s4 + $0x1d0] sm:$0xff]  }
 0x123   : > { %v849_v26 = vor.u32 %v847_v17, %v846_v20  ;;  %v1084_v30 = vshll.u32 %v1034_v22, 16  ;;  %v1073_v46 = vshrl.u32 %v2721_v31, 16  ;;  %v1076_v56 = vshll.u32 %v2721_v31, 16  ;;  %v2724_v17 = vld [vmem:[%s3357_s4 + $0x100] sm:$0xff]   ;;  %v2726_v8 = vld [vmem:[%s3357_s4 + $0x148] sm:$0xff]  }
 0x124   : > { %906 = vst [vmem:[#allocation2 + $0x28] sm:$0xf] %v2338_v24  ;;  %907 = vst [vmem:[#allocation2 + $0x2c] sm:$0x1] %v2339_v57  ;;  %v2712_v32 = vld [vmem:[#allocation2 + $0x20] sm:$0x1f]   ;;  %v2340_v37 = vcombine.low %v887_v27, %v887_v27  ;;  %v1135_v22 = vsel %vm3075_vm9, %v3116_v51, %v1071_v5  ;;  %v984_v57 = vor.u32 %v983_v19, %v979_v18 }
 0x125   : > { %v851_v35 = vsel %vm3018_vm5, 0, %v849_v26  ;;  %v1083_v10 = vrot.slane %v1081_v29, 3  ;;  %v1086_v38 = vrot.slane %v1084_v30, 4  ;;  %v1046_v41 = vshrl.u32 %v2712_v32, 16  ;;  %v2728_v24 = vld [vmem:[%s3357_s4 + $0x108] sm:$0xff]   ;;  %v2730_v51 = vld [vmem:[%s3357_s4 + $0x150] sm:$0xff]  }
 0x126   : > { %v2334_v39 = vcombine.low %v851_v35, %v851_v35  ;;  %v2335_v40 = vcombine.high %v851_v35, %v851_v35  ;;  %v1048_v43 = vshll.u32 %v2712_v32, 16  ;;  %v912_v45 = vshrl.u32 %v2340_v37, 16  ;;  %v2729_v26 = vld [vmem:[%s3357_s4 + $0x1d8] sm:$0xff]   ;;  %v2732_v27 = vld [vmem:[%s3357_s4 + $0x110] sm:$0xff]   ;;  %v2733_v32 = vld [vmem:[%s3357_s4 + $0x1e0] sm:$0xff]  }
 0x127   : > { %v915_v42 = vshll.u32 %v2340_v37, 16  ;;  %v1088_v50 = vrot.slane %v1046_v41, 3  ;;  %v1087_v54 = vor.u32 %v1086_v38, %v1083_v10  ;;  %v1075_v55 = vrot.slane %v1073_v46, 3  ;;  %v2731_v29 = vld [vmem:[%s3357_s4 + $0x198] sm:$0xff]   ;;  %v2735_v10 = vld [vmem:[%s3357_s4 + $0x1a0] sm:$0xff]   ;;  %v2739_v34 = vld [vmem:[%s3357_s4 + $0x1a8] sm:$0xff]  }
 0x128   : > { %860 = vst [vmem:[#allocation3 + $0x20] sm:$0xf] %v2334_v39  ;;  %v862_v47 = vsel %vm3018_vm5, %v2335_v40, %v861_v36  ;;  %v1050_v49 = vrot.slane %v1048_v43, 1  ;;  %v1089_v52 = vrot.slane %v1048_v43, 4  ;;  %v914_v53 = vrot.slane %v912_v45, 7  ;;  %v2734_v30 = vld [vmem:[%s3357_s4 + $0x158] sm:$0xff]  }
 0x129   : > { %863 = vst [vmem:[#allocation3 + $0x24] sm:$0x1] %v862_v47  ;;  %v1078_v63 = vrot.slane %v1076_v56, 4  ;;  %v1137_v12 = vsel %vm3075_vm9, %v964_v33, %v1087_v54  ;;  %v2736_v35 = vld [vmem:[%s3357_s4 + $0x118] sm:$0xff]   ;;  %v2738_v38 = vld [vmem:[%s3357_s4 + $0x160] sm:$0xff]   ;;  %v2737_v39 = vld [vmem:[%s3357_s4 + $0x1e8] sm:$0xff]  }
 0x12a   : > { %v1090_v58 = vor.u32 %v1089_v52, %v1088_v50  ;;  %v1051_v61 = vor.u32 %v1050_v49, %v1046_v41  ;;  %v917_v62 = vor.u32 %v915_v42, %v914_v53  ;;  %v2740_v45 = vld [vmem:[#allocation3 + $0x10] sm:$0x1f]   ;;  %v2744_v47 = vld [vmem:[%s3357_s4 + $0x168] sm:$0xff]   ;;  %v2743_v49 = vld [vmem:[%s3357_s4 + $0x1f0] sm:$0xff]  }
 0x12b   : > { %v1079_v13 = vor.u32 %v1078_v63, %v1075_v55  ;;  %v2752_v43 = vld [vmem:[#allocation2 + $0x28] sm:$0x1f]   ;;  %v2742_v46 = vld [vmem:[%s3357_s4 + $0x120] sm:$0xff]   ;;  %v2745_v55 = vld [vmem:[%s3357_s4 + $0x1b0] sm:$0xff]  }
 0x12c   : > { %v1138_v1 = vsel %vm3075_vm9, %v2711_v48, %v1090_v58  ;;  %v1100_v6 = vshrl.u32 %v1051_v61, 16  ;;  %v1103_v7 = vshll.u32 %v1051_v61, 16  ;;  %v919_v9 = vsel %vm3018_vm5, 0, %v917_v62  ;;  %v2748_v56 = vld [vmem:[%s3357_s4 + $0x170] sm:$0xff]  }
 0x12d   : > { %1807 = vmatprep.mubr.bf16.mxu1 %v1138_v1  ;;  %v2341_v14 = vcombine.low %v919_v9, %v919_v9  ;;  %v2342_v15 = vcombine.high %v919_v9, %v919_v9  ;;  %v1136_v2 = vsel %vm3075_vm9, %v2720_v60, %v1079_v13  ;;  %v1063_v52 = vshrl.u32 %v2752_v43, 16  ;;  %v2749_v1 = vld [vmem:[%s3357_s4 + $0x1b8] sm:$0xff]  }
 0x12e   : > { %1808 = vmatmul.mubr.bf16.vlgmr.msra.gmra.mrb[8].mxu1 %v1137_v12  ;;  %v1102_v28 = vrot.slane %v1100_v6, 3  ;;  %v1105_v20 = vrot.slane %v1103_v7, 4  ;;  %1759 = vmatprep.mubr.bf16.mxu0 %v1136_v2  ;;  %v1065_v53 = vshll.u32 %v2752_v43, 16  ;;  %v2751_v12 = vld [vmem:[#allocation2 + $0x10] sm:$0x1f]   ;;  %v2758_v2 = vld [vmem:[%s3357_s4 + $0x208] sm:$0xff]  }
 0x12f   : > { %2541 = vmatpush3.bf16.msra.mxu1 %v2717_v59  ;;  %1815 = vmatprep.mubr.bf16.mxu1 %v1090_v58  ;;  %928 = vst [vmem:[#allocation3 + $0x28] sm:$0xf] %v2341_v14  ;;  %v930_v21 = vsel %vm3018_vm5, %v2342_v15, %v929_v11  ;;  %v2747_v58 = vld [vmem:[%s3357_s4 + $0x1f8] sm:$0xff]   ;;  %v1107_v61 = vrot.slane %v1063_v52, 3 }
 0x130   : > { %2542 = vmatprep.subr.bf16.mxu1 %v2719_v3  ;;  %931 = vst [vmem:[#allocation3 + $0x2c] sm:$0x1] %v930_v21  ;;  %1760 = vmatmul.mubr.bf16.vlgmr.msra.gmra.mrb[16].mxu0 %v1135_v22  ;;  %v3179_v25 = vor.u32 %v1105_v20, %v1102_v28  ;;  %v2756_v50 = vld [vmem:[#allocation3 + $0x20] sm:$0x1f]   ;;  %v1108_v62 = vrot.slane %v1065_v53, 4  ;;  %v1067_v63 = vrot.slane %v1065_v53, 1 }
 0x131   : > { %2513 = vmatpush3.bf16.msra.mxu0 %v2724_v17  ;;  %1767 = vmatprep.mubr.bf16.mxu0 %v1079_v13  ;;  %v1092_v59 = vshrl.u32 %v2756_v50, 16  ;;  %v1095_v60 = vshll.u32 %v2756_v50, 16  ;;  %v2753_v3 = vld [vmem:[%s3357_s4 + $0x178] sm:$0xff]   ;;  %v2757_v13 = vld [vmem:[%s3357_s4 + $0x200] sm:$0xff]   ;;  %v2759_v21 = vld [vmem:[%s3357_s4 + $0x210] sm:$0xff]  }
 0x132   : > { %2514 = vmatprep.subr.bf16.mxu0 %v2726_v8  ;;  %v1140_v31 = vsel %vm3075_vm9, %v984_v57, %v3179_v25  ;;  %v1109_v7 = vor.u32 %v1108_v62, %v1107_v61  ;;  %v1068_v9 = vor.u32 %v1067_v63, %v1063_v52  ;;  %v2754_v11 = vld [vmem:[%s3357_s4 + $0x138] sm:$0xff]   ;;  %v1001_v8 = vshll.u32 %v2751_v12, 16 }
 0x133   : > { %2543 = vmatpush3.bf16.msra.mxu1 %v2723_v16  ;;  %v1097_v6 = vrot.slane %v1095_v60, 4  ;;  %v2755_v14 = vld [vmem:[#allocation3 + $0x8] sm:$0x1f]  }
 0x134   : > { %2544 = vmatprep.subr.bf16.mxu1 %v2725_v23  ;;  %v1141_v16 = vsel %vm3075_vm9, %v2751_v12, %v1109_v7  ;;  %v1119_v17 = vshrl.u32 %v1068_v9, 16  ;;  %v1122_v18 = vshll.u32 %v1068_v9, 16  ;;  %v1003_v22 = vrot.slane %v1001_v8, 1 }
 0x135   : > { %2515 = vmatpush3.bf16.msra.mxu0 %v2728_v24  ;;  %v999_v23 = vshrl.u32 %v2751_v12, 16 }
 0x136   : > { %1816 = vmatmul.mubr.bf16.gmra.mrb[12].mxu1 %v1087_v54  ;;  %2516 = vmatprep.subr.bf16.mxu0 %v2730_v51  ;;  %v2746_v54 = vld [vmem:[%s3357_s4 + $0x128] sm:$0xff]   ;;  %v1121_v28 = vrot.slane %v1119_v17, 3  ;;  %v1124_v20 = vrot.slane %v1122_v18, 4  ;;  %v2760_v51 = vld [vmem:[%s3357_s4 + $0x218] sm:$0xff]  }
 0x137   : > { %2545 = vmatpush3.bf16.msra.mxu1 %v2727_v44  ;;  %v2741_v33 = vld [vmem:[#allocation3 + $0x28] sm:$0x1f]   ;;  %v1004_v44 = vor.u32 %v1003_v22, %v999_v23 }
 0x138   : > { %2546 = vmatprep.subr.bf16.mxu1 %v2729_v26  ;;  %1768 = vmatmul.mubr.bf16.gmra.mrb[20].mxu0 %v1071_v5  ;;  %v1111_v36 = vshrl.u32 %v2741_v33, 16  ;;  %v1114_v37 = vshll.u32 %v2741_v33, 16  ;;  %v1094_v5 = vrot.slane %v1092_v59, 3  ;;  %v1125_v24 = vor.u32 %v1124_v20, %v1121_v28  ;;  %v2762_v26 = vld [vmem:[%s3357_s4 + $0x228] sm:$0xff]  }
 0x139   : > { %2517 = vmatpush3.bf16.msra.mxu0 %v2732_v27  ;;  %1855 = vmatprep.mubr.bf16.mxu0 %v1140_v31  ;;  %v2764_v27 = vld [vmem:[%s3357_s4 + $0x238] sm:$0xff]  }
 0x13a   : > { %2518 = vmatprep.subr.bf16.mxu0 %v2734_v30  ;;  %v1113_v40 = vrot.slane %v1111_v36, 3  ;;  %v1116_v41 = vrot.slane %v1114_v37, 4  ;;  %v1098_v15 = vor.u32 %v1097_v6, %v1094_v5  ;;  %v1143_v57 = vsel %vm3075_vm9, %v1004_v44, %v1125_v24  ;;  %v2355_v37 = vld [vmem:[%s3358_s5] ss:$0 sm:$0xff] }
 0x13b   : > { %2547 = vmatpush3.bf16.msra.mxu1 %v2731_v29  ;;  %v2831_v44 = vmov 1966171168  }
 0x13c   : > { %2548 = vmatprep.subr.bf16.mxu1 %v2733_v32  ;;  %v1117_v42 = vor.u32 %v1116_v41, %v1113_v40  ;;  %v1139_v19 = vsel %vm3075_vm9, %v2755_v14, %v1098_v15 }
 0x13d   : > { %2519 = vmatpush3.bf16.msra.mxu0 %v2736_v35 }
 0x13e   : > { %2520 = vmatprep.subr.bf16.mxu0 %v2738_v38  ;;  %v1142_v48 = vsel %vm3075_vm9, %v2740_v45, %v1117_v42 }
 0x13f   : > { %2549 = vmatpush3.bf16.msra.mxu1 %v2735_v10  ;;  %1903 = vmatprep.mubr.bf16.mxu1 %v1142_v48 }
 0x140   : > { %2550 = vmatprep.subr.bf16.mxu1 %v2737_v39 }
 0x141   : > { %2521 = vmatpush3.bf16.msra.mxu0 %v2742_v46 }
 0x142   : > { %2522 = vmatprep.subr.bf16.mxu0 %v2744_v47 }
 0x143   : > { %2551 = vmatpush3.bf16.msra.mxu1 %v2739_v34 }
 0x144   : > { %2552 = vmatprep.subr.bf16.mxu1 %v2743_v49 }
 0x145   : > { %2523 = vmatpush3.bf16.msra.mxu0 %v2746_v54 }
 0x146   : > { %2524 = vmatprep.subr.bf16.mxu0 %v2748_v56 }
 0x147   : > { %2553 = vmatpush3.bf16.msra.mxu1 %v2745_v55 }
 0x148   : > { %2554 = vmatprep.subr.bf16.mxu1 %v2747_v58 }
 0x149   : > { %2525 = vmatpush3.bf16.msra.mxu0 %v2750_v0 }
 0x14a   : > { %2526 = vmatprep.subr.bf16.mxu0 %v2753_v3 }
 0x14b   : > { %2555 = vmatpush3.bf16.msra.mxu1 %v2749_v1 }
 0x14d   : > { %2527 = vmatpush3.bf16.msra.mxu0 %v2754_v11 }
 0x14e   : > { %1904 = vmatmul.mubr.bf16.vlgmr.msra.gmra.mrb[16].mxu1 %v1141_v16  ;;  %2606 = vmatprep.subr.bf16.mxu0 %v2757_v13 }
 0x14f   : > { %1911 = vmatprep.mubr.bf16.mxu1 %v1117_v42 }
 0x150   : > { %1856 = vmatmul.mubr.bf16.vlgmr.msra.gmra.mrb[24].mxu0 %v1139_v19 }
 0x151   : > { %1863 = vmatprep.mubr.bf16.mxu0 %v3179_v25  ;;  %2607 = vmatpush3.bf16.msra.mxu0 %v2757_v13  ;;  %v2761_v25 = vld [vmem:[%s3357_s4 + $0x220] sm:$0xff]  }
 0x152   : > { %2608 = vmatprep.subr.bf16.mxu0 %v2758_v2 }
 0x155   : > { %2609 = vmatpush3.bf16.msra.mxu0 %v2758_v2 }
 0x156   : > { %1912 = vmatmul.mubr.bf16.gmra.mrb[20].mxu1 %v1109_v7  ;;  %2610 = vmatprep.subr.bf16.mxu0 %v2759_v21 }
 0x158   : > { %1864 = vmatmul.mubr.bf16.gmra.mrb[28].mxu0 %v1098_v15 }
 0x159   : > { %2611 = vmatpush3.bf16.msra.mxu0 %v2759_v21  ;;  %2622 = vmatprep.mubr.bf16.mxu0 %v1143_v57  ;;  %v1977_v57 = vlaneseq }
 0x15a   : > { %2612 = vmatprep.subr.bf16.mxu0 %v2760_v51 }
 0x15d   : > { %2613 = vmatpush3.bf16.msra.mxu0 %v2760_v51  ;;  %v1975_v51 = vunpack.c.l.s4 %v2831_v44 }
 0x15e   : > { %2614 = vmatprep.subr.bf16.mxu0 %v2761_v25 }
 0x161   : > { %2615 = vmatpush3.bf16.msra.mxu0 %v2761_v25  ;;  %v1976_v25 = vunpack.c.0.s8 %v1975_v51 }
 0x162   : > { %2616 = vmatprep.subr.bf16.mxu0 %v2762_v26 }
 0x165   : > { %2617 = vmatpush3.bf16.msra.mxu0 %v2762_v26  ;;  %v1978_v26 = vshrl.u32 %v1977_v57, 7 }
 0x166   : > { %2618 = vmatprep.subr.bf16.mxu0 %v2763_v4 }
 0x169   : > { %2619 = vmatpush3.bf16.msra.mxu0 %v2763_v4 }
 0x16a   : > { %2620 = vmatprep.subr.bf16.mxu0 %v2764_v27 }
 0x16d   : > { %2621 = vmatpush3.bf16.msra.mxu0 %v2764_v27 }
 0x170   : > { %2623 = vmatmul.mubr.bf16.vlgmr.msra.gmra.mrb[32].mxu0 %v1125_v24 }
 0x201   : > { %v2500_v29 = vpop.f32.mrb[8].mxu1 }
 0x202   : > { %v2501_v30 = vpop.f32.mrb[9].mxu1 }
 0x203   : > { %v2502_v31 = vadd.f32 %v2501_v30, %v2500_v29  ;;  %v2503_v32 = vpop.f32.mrb[10].mxu1  ;;  %v2472_v35 = vpop.f32.mrb[16].mxu0  ;;  %v3283_v29 = vsub.s32 %v1976_v25, %v1978_v26 }
 0x204   : > { %v2504_v33 = vpop.f32.mrb[11].mxu1  ;;  %v2473_v10 = vpop.f32.mrb[17].mxu0 }
 0x205   : > { %v2505_v36 = vadd.f32 %v2504_v33, %v2503_v32  ;;  %v2474_v38 = vadd.f32 %v2473_v10, %v2472_v35  ;;  %v2475_v39 = vpop.f32.mrb[18].mxu0 }
 0x206   : > { %v2476_v40 = vpop.f32.mrb[19].mxu0 }
 0x207   : > { %v1762_v41 = vadd.f32 %v2474_v38, %v2355_v37  ;;  %v2477_v43 = vadd.f32 %v2476_v40, %v2475_v39 }
 0x209   : > { %v2506_v45 = vpop.f32.mrb[12].mxu1  ;;  %v1765_v42 = vadd.f32 %v2477_v43, %v2355_v37  ;;  %v1810_v34 = vadd.f32 %v2502_v31, %v1762_v41 }
 0x20a   : > { %v2507_v46 = vpop.f32.mrb[13].mxu1 }
 0x20b   : > { %v2508_v47 = vadd.f32 %v2507_v46, %v2506_v45  ;;  %v2509_v48 = vpop.f32.mrb[14].mxu1  ;;  %v2478_v50 = vpop.f32.mrb[20].mxu0  ;;  %v1813_v52 = vadd.f32 %v2505_v36, %v1765_v42 }
 0x20c   : > { %v2510_v49 = vpop.f32.mrb[15].mxu1  ;;  %v2479_v53 = vpop.f32.mrb[21].mxu0 }
 0x20d   : > { %v2480_v54 = vadd.f32 %v2479_v53, %v2478_v50  ;;  %v2481_v55 = vpop.f32.mrb[22].mxu0 }
 0x20e   : > { %v2482_v56 = vpop.f32.mrb[23].mxu0 }
 0x20f   : > { %v1770_v58 = vadd.f32 %v2480_v54, %v2355_v37 }
 0x211   : > { %v1818_v59 = vadd.f32 %v2508_v47, %v1770_v58 }
 0x221   : > { %v2556_v60 = vpop.f32.mrb[16].mxu1 }
 0x222   : > { %v2557_v61 = vpop.f32.mrb[17].mxu1 }
 0x223   : > { %v2558_v62 = vadd.f32 %v2557_v61, %v2556_v60  ;;  %v2559_v63 = vpop.f32.mrb[18].mxu1  ;;  %v2528_v1 = vpop.f32.mrb[24].mxu0 }
 0x224   : > { %v2560_v0 = vpop.f32.mrb[19].mxu1  ;;  %v2529_v5 = vpop.f32.mrb[25].mxu0 }
 0x225   : > { %v2561_v3 = vadd.f32 %v2560_v0, %v2559_v63  ;;  %v2530_v6 = vadd.f32 %v2529_v5, %v2528_v1  ;;  %v2531_v7 = vpop.f32.mrb[26].mxu0 }
 0x226   : > { %v2532_v9 = vpop.f32.mrb[27].mxu0 }
 0x227   : > { %v1858_v11 = vadd.f32 %v2530_v6, %v1810_v34  ;;  %v2533_v12 = vadd.f32 %v2532_v9, %v2531_v7 }
 0x229   : > { %v2562_v13 = vpop.f32.mrb[20].mxu1  ;;  %v1861_v14 = vadd.f32 %v2533_v12, %v1813_v52  ;;  %v1906_v16 = vadd.f32 %v2558_v62, %v1858_v11 }
 0x22a   : > { %v2563_v15 = vpop.f32.mrb[21].mxu1 }
 0x22b   : > { %v2564_v17 = vadd.f32 %v2563_v15, %v2562_v13  ;;  %v2565_v18 = vpop.f32.mrb[22].mxu1  ;;  %v2534_v8 = vpop.f32.mrb[28].mxu0  ;;  %v1909_v19 = vadd.f32 %v2561_v3, %v1861_v14 }
 0x22c   : > { %v2566_v2 = vpop.f32.mrb[23].mxu1  ;;  %v2535_v28 = vpop.f32.mrb[29].mxu0 }
 0x22d   : > { %v2536_v20 = vadd.f32 %v2535_v28, %v2534_v8  ;;  %v2537_v21 = vpop.f32.mrb[30].mxu0 }
 0x22e   : > { %v2538_v22 = vpop.f32.mrb[31].mxu0 }
 0x22f   : > { %v1866_v23 = vadd.f32 %v2536_v20, %v1818_v59 }
 0x231   : > { %v1914_v24 = vadd.f32 %v2564_v17, %v1866_v23 }
 0x243   : > { %v2624_v4 = vpop.f32.mrb[32].mxu0 }
 0x244   : > { %v1962_v27 = vadd.f32 %v2624_v4, %v1914_v24  ;;  %v1953_v30 = vpop.f32.mrb[33].mxu0 }
 0x245   : > { %v1954_v31 = vadd.f32 %v1953_v30, %v1906_v16  ;;  %v2625_v32 = vpop.f32.mrb[34].mxu0 }
 0x246   : > { %v1969_v33 = vmax.f32 %v1962_v27, 0.0  ;;  %v1956_v35 = vpop.f32.mrb[35].mxu0 }
 0x247   : > { %v1967_v36 = vmax.f32 %v1954_v31, 0.0  ;;  %v1957_v37 = vadd.f32 %v1956_v35, %v1909_v19 }
 0x248   : > { %v2077_v10 = vrot.slane %v1969_v33, %v3283_v29 }
 0x249   : > { %v1973_v38 = vcombine.high %v1967_v36, %v1967_v36  ;;  %v1980_v39 = vrot.slane %v1967_v36, %v3283_v29  ;;  %v1968_v40 = vmax.f32 %v1957_v37, 0.0 }
 0x24a   : > { %v2078_v41 = vcombine.high %v2077_v10, %v2077_v10  ;;  %v2085_v62 = vrot.slane %v2077_v10, %v3283_v29 }
 0x24b   : > { %v1987_v43 = vrot.slane %v1973_v38, %v3283_v29  ;;  %v1988_v45 = vcombine.high %v1980_v39, %v1980_v39  ;;  %v2022_v42 = vcombine.high %v1968_v40, %v1968_v40  ;;  %v2029_v46 = vrot.slane %v1968_v40, %v3283_v29 }
 0x24c   : > { %v2092_v34 = vrot.slane %v2078_v41, %v3283_v29  ;;  %v1996_v48 = vrot.slane %v1980_v39, %v3283_v29 }
 0x24d   : > { %v1989_v47 = vcombine.high %v1987_v43, %v1987_v43  ;;  %v2010_v49 = vrot.slane %v1988_v45, %v3283_v29  ;;  %v2036_v50 = vrot.slane %v2022_v42, %v3283_v29  ;;  %v2037_v52 = vcombine.high %v2029_v46, %v2029_v46 }
 0x24e   : > { %v2045_v53 = vrot.slane %v2029_v46, %v3283_v29  ;;  %v2003_v54 = vrot.slane %v1987_v43, %v3283_v29  ;;  %v2018_v63 = vcombine.high %v1996_v48, %v1996_v48 }
 0x24f   : > { %v2017_v55 = vrot.slane %v1989_v47, %v3283_v29  ;;  %v2020_v56 = vcombine.high %v2010_v49, %v2010_v49  ;;  %v2038_v58 = vcombine.high %v2036_v50, %v2036_v50  ;;  %v2052_v59 = vrot.slane %v2036_v50, %v3283_v29 }
 0x250   : > { %v2059_v60 = vrot.slane %v2037_v52, %v3283_v29  ;;  %v2067_v61 = vcombine.high %v2045_v53, %v2045_v53  ;;  %v2119_v1 = vmax.f32 %v2045_v53, %v2092_v34  ;;  %v2019_v9 = vcombine.high %v2003_v54, %v2003_v54 }
 0x251   : > { %v2021_v0 = vcombine.high %v2017_v55, %v2017_v55  ;;  %v2066_v3 = vrot.slane %v2038_v58, %v3283_v29  ;;  %v2068_v5 = vcombine.high %v2052_v59, %v2052_v59  ;;  %v2114_v12 = vmax.f32 %v2020_v56, %v2052_v59 }
 0x252   : > { %v2069_v6 = vcombine.high %v2059_v60, %v2059_v60  ;;  %v2111_v7 = vmax.f32 %v1996_v48, %v2059_v60  ;;  %v2112_v11 = vmax.f32 %v2010_v49, %v2067_v61 }
 0x253   : > { %v2118_v13 = vmax.f32 %v2021_v0, %v2085_v62  ;;  %v2070_v14 = vcombine.high %v2066_v3, %v2066_v3  ;;  %v2115_v16 = vmax.f32 %v2003_v54, %v2066_v3  ;;  %v2116_v17 = vmax.f32 %v2017_v55, %v2068_v5 }
 0x254   : > { %v2113_v15 = vmax.f32 %v2018_v63, %v2069_v6  ;;  %v2120_v18 = vmax.f32 %v2111_v7, %v2112_v11 }
 0x255   : > { %v2127_v2 = vmax.f32 %v2118_v13, %v2119_v1  ;;  %v2117_v8 = vmax.f32 %v2019_v9, %v2070_v14  ;;  %v2123_v20 = vmax.f32 %v2114_v12, %v2115_v16  ;;  %v2124_v21 = vmax.f32 %v2115_v16, %v2116_v17 }
 0x256   : > { %v2121_v19 = vmax.f32 %v2112_v11, %v2113_v15  ;;  %v2122_v28 = vmax.f32 %v2113_v15, %v2114_v12 }
 0x257   : > { %v2125_v22 = vmax.f32 %v2116_v17, %v2117_v8  ;;  %v2126_v23 = vmax.f32 %v2117_v8, %v2118_v13 }
 0x258   : > { %v2136_v24 = vcombine.low %v2120_v18, %v2121_v19  ;;  %v2137_v44 = vcombine.low %v2122_v28, %v2123_v20 }
 0x259   : > { %v2139_v51 = vcombine.low %v2126_v23, %v2127_v2  ;;  %v2138_v57 = vcombine.low %v2124_v21, %v2125_v22 }
 0x25a   : > { %v2146_v25 = vrot.slane %v2136_v24, %v3283_v29  ;;  %v2153_v26 = vrot.slane %v2137_v44, %v3283_v29 }
 0x25b   : > { %v2160_v4 = vrot.slane %v2138_v57, %v3283_v29  ;;  %v2167_v27 = vrot.slane %v2139_v51, %v3283_v29 }
 0x25c   : > { %v2168_v30 = vcombine.low %v2146_v25, %v2153_v26 }
 0x25d   : > { %v2169_v31 = vcombine.low %v2160_v4, %v2167_v27 }
 0x25e   : > { %v2176_v32 = vrot.slane %v2168_v30, %v3283_v29 }
 0x25f   : > { %v2183_v33 = vrot.slane %v2169_v31, %v3283_v29 }
 0x261   : > { %v2184_v35 = vcombine.low %v2176_v32, %v2183_v33 }
 0x263   : > { %2186 = vst [vmem:[%s259_s26] sm:$0xff] %v2184_v35 }
 0x264   : > { %2778 = shalt.err (!%p2775_p3)
}
 0x265   : > { %s2779_s15 = scalar_lea.hbm %s3311_s10, 128  ;;  %s2783_s18 = scalar_lea.hbm %s3359_s6, 256 }
 0x266   : > { %p2780_p4 = scmp.ne.s32.totalorder %s3311_s10, %s2779_s15  ;;  %p2784_p9 = scmp.lt.u32.totalorder %s3311_s10, %s3359_s6 }
 0x267   : > { %p2785_p10 = scmp.lt.u32.totalorder %s2783_s18, %s2779_s15  ;;  %p2787_p12 = scmp.lt.u32.totalorder %s2779_s15, %s3311_s10 }
 0x268   : > { %p2781_p7 = pnand %p2780_p4, %p2906_p5 }
 0x269   : > { %p2786_p11 = por %p2785_p10, %p2784_p9 }
 0x26a   : > { %p2782_p8 = pneg %p2781_p7 }
 0x26b   : > { %p2788_p13 = por %p2787_p12, %p2786_p11 }
 0x26d   : > { %p2789_p0 = pnand %p2788_p13, %p2782_p8 }
 0x26f   : > { %2792 = shalt.err (!%p2789_p0)
}
 0x270   : > { %2626 = dma.vmem_to_hbm [thread:$0]  (%p2906_p5), %s3313_s28, 128, %s3311_s10, %s2188_s11  }
 0x271 PF: > { %p2632_p1 = scmp.ge.s32.totalorder %s2827_s24, 2  ;;  %s2213_s26 = sand.u32 1, %s2815_s21  }
 0x272   : > { %s2214_s29 = scalar_lea.sflag [#allocation5], %s2213_s26 }
 0x273   : > { %p2629_p2 = pnand %p2632_p1, %p2910_p6 }
 0x275   : > { %2810 = dma.done.wait (!%p2629_p2), %s2214_s29, 128  }
 0x276   : > { %2812 = vsyncadd (!%p2629_p2), %s2214_s29, 4294967168  ;;  %p16_p3 = scmp.ge.s32.totalorder %s2893_s27, 4   ;;  %s3368_s21 = smov %s2819_s22 }
 0x277   : > { %s3369_s22 = smov %s2823_s23  ;;  %s3370_s23 = smov %s2904_s30 }
 0x278   : > { %s3371_s24 = smov %s2893_s27  ;;  %18 = sbr.rel (!%p16_p3) target bundleno = 3 (0x3), region = 92 }
 0x27f   :  { %2219 = vsyncpa [#allocation5], 1 }
 0x280   :  { %2221 = vsyncpa [#allocation5 + $0x1], 1 }

</bundles_post_ra>
